<compile_context>
chip_gen: v7x
topology: tpu7x:2x2x1
jax: 0.10.0
libtpu: 0.0.40
codegen_flags: <defaults>
</compile_context>

<pallas_src>
import jax
import jax.numpy as jnp
import numpy as np
from jax.experimental import pallas as pl
from jax.experimental.pallas import tpu as pltpu

MAX_NB = 8
HIDDEN = 32
VOCAB = 16
LANES = 128          # lane-dense output slab width (vocab logits 0..V-1, stop logit at lane V)


# ------------------------------------------------------------------ tree glue
class MolTreeNode:
    def __init__(self, smiles=""):
        self.smiles = smiles
        self.idx = -1
        self.wid = 0
        self.clique = []
        self.neighbors = []

    def __str__(self):
        return str(self.wid)


class MolTree:
    def __init__(self, nodes):
        self.nodes = nodes


def dfs(stack, x, fa):
    for y in x.neighbors:
        if y.idx == fa.idx:
            continue
        stack.append((x, y, 1))
        dfs(stack, y, x)
        stack.append((y, x, 0))


# ---------------------------------------------------------------- parameters
def init_params(key):
    ks = jax.random.split(key, 16)
    H, V = HIDDEN, VOCAB

    def lin(k, fan_in, shape):
        bound = 1.0 / (fan_in ** 0.5)
        return jax.random.uniform(k, shape, jnp.float32, -bound, bound)

    p = {}
    p["W_z"] = lin(ks[0], 2 * H, (2 * H, H))
    p["b_z"] = lin(ks[1], 2 * H, (1, H))
    p["W_r"] = lin(ks[2], H, (H, H))
    p["b_r"] = lin(ks[3], H, (1, H))
    p["U_r"] = lin(ks[4], H, (H, H))          # no bias
    p["W_h"] = lin(ks[5], 2 * H, (2 * H, H))
    p["b_h"] = lin(ks[6], 2 * H, (1, H))
    p["W"] = lin(ks[7], H, (H, H))
    p["b_W"] = lin(ks[8], H, (1, H))
    p["W_o"] = lin(ks[9], H, (H, V))
    p["b_o"] = lin(ks[10], H, (1, V))
    p["U"] = lin(ks[11], 2 * H, (2 * H, H))
    p["b_U"] = lin(ks[12], 2 * H, (1, H))
    p["U_s"] = lin(ks[13], H, (H, 1))
    p["b_s"] = lin(ks[14], H, (1, 1))
    return p


def pack_params(p):
    """Pack weights into 6 VMEM-resident arrays.

    Wx    (32,128): [W_z_x | W_r | W_h_x | U_x]  -> lane-perfect x-side dot
    bx    (1,128):  [b_z   | b_r | b_h   | b_U]
    Wsq   (5,32,32): [W_z_h, W_h_h, U_r, U_o, W]
    bwp   (1,32):   b_W
    Whead (2,32,128): [W_o padded to lanes 0..V-1 ; U_s padded to lane V]
    bhead (1,128):  b_o in lanes 0..V-1, b_s in lane V
    """
    H, V = HIDDEN, VOCAB
    Wx = jnp.concatenate([p["W_z"][:H], p["W_r"], p["W_h"][:H], p["U"][:H]], axis=1)
    bx = jnp.concatenate([p["b_z"], p["b_r"], p["b_h"], p["b_U"]], axis=1)
    Wsq = jnp.stack([p["W_z"][H:], p["W_h"][H:], p["U_r"], p["U"][H:], p["W"]], axis=0)
    Whead = jnp.stack([
        jnp.zeros((H, LANES), jnp.float32).at[:, :V].set(p["W_o"]),
        jnp.zeros((H, LANES), jnp.float32).at[:, V:V + 1].set(p["U_s"]),
    ], axis=0)
    bhead = (jnp.zeros((1, LANES), jnp.float32)
             .at[:, :V].set(p["b_o"])
             .at[:, V:V + 1].set(p["b_s"]))
    return {"Wx": Wx, "bx": bx, "Wsq": Wsq, "bwp": p["b_W"],
            "Whead": Whead, "bhead": bhead}


# --------------------------------------------------------- the fused kernel
def _motif_dfs_kernel(hout_ref,                 # SMEM (T*B,) int32 scatter rows (-1 = skip)
                      x_ref,                    # (T, B, H)   node embeddings per step
                      nei_ref,                  # (T, 2*B*NB, 1) int32 gather rows (-1 = zero)
                      wx_ref, bx_ref,           # (H, 4H), (1, 4H)
                      wsq_ref,                  # (5, H, H): Wzh, Whh, Ur, Uo, Wp
                      bwp_ref,                  # (1, H)
                      whead_ref, bhead_ref,     # (2, H, 128), (1, 128)
                      out_ref,                  # (T, B, 128) merged head output
                      h_tab_ref):               # scratch (E_pad, H) persistent edge hiddens
    T, B, H = x_ref.shape
    NB = MAX_NB
    BN = B * NB
    E = h_tab_ref.shape[0]

    # zero the persistent edge-hidden table once
    h_tab_ref[...] = jnp.zeros_like(h_tab_ref)

    # hoisted: edge-id iota for the one-hot gather (built once, reused every step)
    e_iota = jax.lax.broadcasted_iota(jnp.int32, (2 * BN, E), 1)

    def step(t, carry):
        x = x_ref[t]                                                 # (B, H)

        # ---- fused one-hot gather of BOTH neighbor sets: one MXU dot ----
        idx = nei_ref[t]                                             # (2*B*NB, 1)
        oh = (idx == e_iota).astype(jnp.float32)                     # (2*B*NB, E); -1 rows -> 0
        nei_flat = jnp.dot(oh, h_tab_ref[...],
                           preferred_element_type=jnp.float32)       # (2*B*NB, H)
        h_nei_flat = nei_flat[:BN]                                   # (B*NB, H)
        h_nei = h_nei_flat.reshape(B, NB, H)
        o_nei = nei_flat[BN:].reshape(B, NB, H)
        sum_h = jnp.sum(h_nei, axis=1)                               # (B, H)
        cur_o = jnp.sum(o_nei, axis=1)                               # (B, H)

        # ---- fused x-side matmul: (B,32)@(32,128) -> [z_x | r_x | h_x | s_x] ----
        xw = jnp.dot(x, wx_ref[...], preferred_element_type=jnp.float32) + bx_ref[...]
        zx = xw[:, 0:H]
        rx = xw[:, H:2 * H]
        hx = xw[:, 2 * H:3 * H]
        sx = xw[:, 3 * H:4 * H]                                      # x @ U_x + b_U

        # ---- GRU cell ----
        z = jax.nn.sigmoid(
            zx + jnp.dot(sum_h, wsq_ref[0], preferred_element_type=jnp.float32))
        r2 = jnp.dot(h_nei_flat, wsq_ref[2],
                     preferred_element_type=jnp.float32).reshape(B, NB, H)
        r = jax.nn.sigmoid(rx.reshape(B, 1, H) + r2)
        sum_gated = jnp.sum(r * h_nei, axis=1)
        pre_h = jnp.tanh(
            hx + jnp.dot(sum_gated, wsq_ref[1], preferred_element_type=jnp.float32))
        new_h = (1.0 - z) * sum_h + z * pre_h                        # (B, H)

        # ---- scatter: per-row dynamic stores from SMEM indices (overwrite; -1 skipped) ----
        base = t * B
        for b in range(B):                                           # static unroll, B small
            eidx = hout_ref[base + b]

            @pl.when(eidx >= 0)
            def _():
                h_tab_ref[pl.ds(eidx, 1), :] = new_h[b:b + 1, :]

        # ---- fused heads -> one lane-dense (B,128) slab ----
        pv = jnp.maximum(
            jnp.dot(new_h, wsq_ref[4], preferred_element_type=jnp.float32)
            + bwp_ref[...], 0.0)
        sv = jnp.maximum(
            sx + jnp.dot(cur_o, wsq_ref[3], preferred_element_type=jnp.float32), 0.0)
        out_ref[t] = (jnp.dot(pv, whead_ref[0], preferred_element_type=jnp.float32)
                      + jnp.dot(sv, whead_ref[1], preferred_element_type=jnp.float32)
                      + bhead_ref[...])
        return carry

    jax.lax.fori_loop(0, T, step, 0)


def motif_sequence_pallas(h_out_flat, cur_x_all, nei_all, w, e_pad):
    T, B, H = cur_x_all.shape

    def full_spec(shape):
        nd = len(shape)
        return pl.BlockSpec(tuple(shape), lambda t, hout, _nd=nd: (0,) * _nd)

    weight_order = ["Wx", "bx", "Wsq", "bwp", "Whead", "bhead"]
    weights = [w[k] for k in weight_order]
    tensor_inputs = [cur_x_all, nei_all] + weights

    grid_spec = pltpu.PrefetchScalarGridSpec(
        num_scalar_prefetch=1,                       # h_out scatter rows -> SMEM
        grid=(1,),                                   # whole sequence = one invocation
        in_specs=[full_spec(a.shape) for a in tensor_inputs],
        out_specs=pl.BlockSpec((T, B, LANES), lambda t, hout: (0, 0, 0)),
        scratch_shapes=[pltpu.VMEM((e_pad, HIDDEN), jnp.float32)])

    return pl.pallas_call(
        _motif_dfs_kernel,
        out_shape=jax.ShapeDtypeStruct((T, B, LANES), jnp.float32),
        grid_spec=grid_spec,
        compiler_params=pltpu.CompilerParams(
            dimension_semantics=("arbitrary",)),
    )(h_out_flat, cur_x_all, nei_all, *weights)


# ------------------------------------------------- host-side schedule builder
def _build_schedule(mol_batch, node_rep_shape):
    num_atoms = node_rep_shape[1]
    super_root = MolTreeNode("")
    super_root.idx = -1

    traces, real_orders = [], []
    for mol_tree in mol_batch:
        if mol_tree is None:
            continue
        s = []
        dfs(s, mol_tree.nodes[0], super_root)
        traces.append(s)
        real_orders.append(" -> ".join(map(str, [node.wid for node in mol_tree.nodes])))
        for node in mol_tree.nodes:
            node.neighbors = []

    num_traces = len(traces)
    max_iter = max(len(tr) for tr in traces)
    T = max_iter + 1                                    # +1 = final root-stop step
    B_pad = max(8, ((num_traces + 7) // 8) * 8)         # sublane-dense rows

    edge_id = {}                                        # (x.idx, y.idx) -> row in h table
    node_gid = {}                                       # (rep_row, id(node)) -> x_embed row
    node_specs = []                                     # gid -> (rep_row, clique)

    def get_gid(rep_row, node):
        if max(node.clique) >= num_atoms:
            # TODO(synk): reference behavior is ill-defined here (row desync in the
            # original torch code); raise instead of silently diverging.
            raise ValueError("clique index out of range of node_rep")
        key = (rep_row, id(node))
        if key not in node_gid:
            node_gid[key] = len(node_specs)
            node_specs.append((rep_row, list(node.clique)))
        return node_gid[key]

    x_idx = np.full((T, B_pad), -1, np.int32)
    nei_h = np.full((T, B_pad, MAX_NB), -1, np.int32)
    nei_o = np.full((T, B_pad, MAX_NB), -1, np.int32)
    h_out = np.full((T, B_pad), -1, np.int32)
    stop_mask = np.zeros((T, B_pad), np.float32)
    stop_tgt = np.zeros((T, B_pad), np.float32)
    pred_mask = np.zeros((T, B_pad), np.float32)
    pred_tgt = np.zeros((T, B_pad), np.int32)
    n_stop_rows, n_stop_targets = 0, 0

    for t in range(max_iter):
        active = [(r, traces[r][t]) for r in range(num_traces) if t < len(traces[r])]
        # pass 1: gather inputs (mirrors reference first loop over prop_list)
        for r, (node_x, real_y, _) in active:
            cur = [edge_id[(ny.idx, node_x.idx)] for ny in node_x.neighbors
                   if ny.idx != real_y.idx][:MAX_NB]
            nei_h[t, r, :len(cur)] = cur
            cur = [edge_id[(ny.idx, node_x.idx)] for ny in node_x.neighbors][:MAX_NB]
            nei_o[t, r, :len(cur)] = cur
            x_idx[t, r] = get_gid(r, node_x)            # reference: node_rep[trace pos]
        # pass 2: bookkeeping / targets (mirrors reference second loop)
        for r, (node_x, node_y, direction) in active:
            key = (node_x.idx, node_y.idx)
            if key not in edge_id:
                edge_id[key] = len(edge_id)
            h_out[t, r] = edge_id[key]
            node_y.neighbors.append(node_x)
            stop_mask[t, r] = 1.0
            stop_tgt[t, r] = float(direction)
            n_stop_rows += 1
            n_stop_targets += 1
            if direction == 1:
                pred_mask[t, r] = 1.0
                pred_tgt[t, r] = node_y.wid

    # final stop prediction at the roots
    t, row = max_iter, 0
    for mol_index, mol_tree in enumerate(mol_batch):
        if mol_tree is None:
            continue
        node_x = mol_tree.nodes[0]
        if max(node_x.clique) >= num_atoms:
            continue
        x_idx[t, row] = get_gid(mol_index, node_x)      # reference: node_rep[batch pos]
        cur = [edge_id[(ny.idx, node_x.idx)] for ny in node_x.neighbors][:MAX_NB]
        # TODO(synk): reference does not truncate >MAX_NB neighbors in this block.
        nei_o[t, row, :len(cur)] = cur
        stop_mask[t, row] = 1.0
        stop_tgt[t, row] = 0.0
        n_stop_rows += 1
        n_stop_targets += 1        # one target per included root (not len(mol_batch))
        row += 1

    if n_stop_rows != n_stop_targets:
        raise ValueError(
            f"Size mismatch: stop_scores ({n_stop_rows}) vs stop_targets ({n_stop_targets})")

    num_nodes = len(node_specs)
    x_idx[x_idx < 0] = num_nodes                        # pad row of x_embed (zeros)
    num_edges = len(edge_id)
    e_pad = max(8, ((num_edges + 7) // 8) * 8)

    rep_rows, atom_idx, seg_ids = [], [], []
    for gid, (rep_row, clique) in enumerate(node_specs):
        for a in clique:
            rep_rows.append(rep_row)
            atom_idx.append(a)
            seg_ids.append(gid)

    # fused gather index table: first B*NB rows = h-neighbors, next B*NB = o-neighbors
    nei_all = np.concatenate(
        [nei_h.reshape(T, B_pad * MAX_NB), nei_o.reshape(T, B_pad * MAX_NB)],
        axis=1).reshape(T, 2 * B_pad * MAX_NB, 1)

    sched = dict(
        T=T, B_pad=B_pad, e_pad=e_pad, num_nodes=num_nodes,
        x_idx=x_idx,
        nei_all=nei_all,
        h_out=h_out.reshape(-1),                        # (T*B_pad,) for SMEM scalar reads
        stop_mask=stop_mask, stop_tgt=stop_tgt,
        pred_mask=pred_mask, pred_tgt=pred_tgt,
        rep_rows=np.asarray(rep_rows, np.int32),
        atom_idx=np.asarray(atom_idx, np.int32),
        seg_ids=np.asarray(seg_ids, np.int32))
    return sched, traces, real_orders


# --------------------------------------------------------------- forward pass
def motif_generation_dfs_forward(params, mol_batch, node_rep):
    H, V = HIDDEN, VOCAB
    sched, traces, real_orders = _build_schedule(mol_batch, node_rep.shape)
    w = pack_params(params)

    # node embeddings: clique-sum of atom reps (single scatter-add) + zero pad row
    vals = node_rep[jnp.asarray(sched["rep_rows"]), jnp.asarray(sched["atom_idx"])]
    x_embed = jnp.zeros((sched["num_nodes"] + 1, H), jnp.float32).at[
        jnp.asarray(sched["seg_ids"])].add(vals)
    cur_x_all = x_embed[jnp.asarray(sched["x_idx"])]             # (T, B_pad, H)

    out = motif_sequence_pallas(
        jnp.asarray(sched["h_out"]),
        cur_x_all,
        jnp.asarray(sched["nei_all"]),
        w, sched["e_pad"])                                       # (T, B_pad, 128)

    pred_mask = jnp.asarray(sched["pred_mask"])                  # (T, B)
    pred_tgt = jnp.asarray(sched["pred_tgt"])
    stop_mask = jnp.asarray(sched["stop_mask"])
    stop_tgt = jnp.asarray(sched["stop_tgt"])
    n_mols = len(mol_batch)

    # ---- word prediction loss (CrossEntropyLoss, sum reduction) ----
    pred_scores = out[..., :V]                                   # (T, B, V)
    logz = jax.nn.logsumexp(pred_scores, axis=-1)
    tgt_score = jnp.take_along_axis(pred_scores, pred_tgt[..., None], axis=-1)[..., 0]
    pred_loss = jnp.sum((logz - tgt_score) * pred_mask) / n_mols
    preds = jnp.argmax(pred_scores, axis=-1)
    n_pred = jnp.maximum(jnp.sum(pred_mask), 1.0)
    pred_acc = jnp.sum((preds == pred_tgt).astype(jnp.float32) * pred_mask) / n_pred

    # ---- stop loss (BCEWithLogitsLoss, sum reduction); stop logit = lane V ----
    stop_scores = out[..., V]                                    # (T, B)
    bce = (jnp.maximum(stop_scores, 0.0) - stop_scores * stop_tgt
           + jnp.log1p(jnp.exp(-jnp.abs(stop_scores))))
    stop_loss = jnp.sum(bce * stop_mask) / n_mols
    stops = (stop_scores >= 0).astype(jnp.float32)
    n_stop = jnp.maximum(jnp.sum(stop_mask), 1.0)
    stop_acc = jnp.sum((stops == stop_tgt).astype(jnp.float32) * stop_mask) / n_stop

    # accuracies returned as device arrays (no blocking host sync)
    return (pred_loss, stop_loss, pred_acc, stop_acc, traces, real_orders)


# ------------------------------------------------------------- test data
def build_mol_batch():
    # Mol 0: star  node0 - {node1, node2}
    n0 = [MolTreeNode() for _ in range(3)]
    wids0 = [1, 2, 3]
    cliques0 = [[0, 1], [2, 3], [4]]
    for i, nd in enumerate(n0):
        nd.idx, nd.wid, nd.clique = i, wids0[i], cliques0[i]
    n0[0].neighbors = [n0[1], n0[2]]
    n0[1].neighbors = [n0[0]]
    n0[2].neighbors = [n0[0]]

    # Mol 1: chain node0 - node1 - node2 - node3
    n1 = [MolTreeNode() for _ in range(4)]
    wids1 = [4, 5, 6, 7]
    cliques1 = [[0], [1, 2], [3, 4, 5], [6]]
    for i, nd in enumerate(n1):
        nd.idx, nd.wid, nd.clique = 100 + i, wids1[i], cliques1[i]
    n1[0].neighbors = [n1[1]]
    n1[1].neighbors = [n1[0], n1[2]]
    n1[2].neighbors = [n1[1], n1[3]]
    n1[3].neighbors = [n1[2]]

    return [MolTree(n0), MolTree(n1)]


if __name__ == "__main__":
    key = jax.random.PRNGKey(0)
    k_rep, k_par = jax.random.split(key)

    mol_batch = build_mol_batch()
    # node_rep: per-molecule atom representations, (num_mols, num_atoms, HIDDEN)
    node_rep = jax.random.normal(k_rep, (2, 10, HIDDEN), dtype=jnp.float32)
    params = init_params(k_par)

    (pred_loss, stop_loss, pred_acc, stop_acc,
     traces, orders) = motif_generation_dfs_forward(params, mol_batch, node_rep)

    jax.block_until_ready((pred_loss, stop_loss, pred_acc, stop_acc))
    assert jnp.isfinite(pred_loss) and jnp.isfinite(stop_loss)
    print("KERNEL_OK")
</pallas_src>

<mosaic_0001>
module attributes {stable_mosaic.version = 11 : i64} {
  func.func @_motif_dfs_kernel(%arg0: i32, %arg1: memref<56xi32, #tpu.memory_space<smem>>, %arg2: memref<7x8x32xf32, #tpu.memory_space<vmem>>, %arg3: memref<7x128x1xi32, #tpu.memory_space<vmem>>, %arg4: memref<32x128xf32, #tpu.memory_space<vmem>>, %arg5: memref<1x128xf32, #tpu.memory_space<vmem>>, %arg6: memref<5x32x32xf32, #tpu.memory_space<vmem>>, %arg7: memref<1x32xf32, #tpu.memory_space<vmem>>, %arg8: memref<2x32x128xf32, #tpu.memory_space<vmem>>, %arg9: memref<1x128xf32, #tpu.memory_space<vmem>>, %arg10: memref<7x8x128xf32, #tpu.memory_space<vmem>>, %arg11: memref<16x32xf32, #tpu.memory_space<vmem>>) attributes {dimension_semantics = [#tpu.dimension_semantics<arbitrary>], iteration_bounds = array<i64: 1>, scalar_prefetch = 1 : i64, scratch_operands = 1 : i64, tpu.core_type = #tpu.core_type<tc>, window_params = [{pipeline_mode = #tpu.pipeline_mode<synchronous>, transform_indices = @transform_0, window_bounds = array<i64: 7, 8, 32>}, {pipeline_mode = #tpu.pipeline_mode<synchronous>, transform_indices = @transform_1, window_bounds = array<i64: 7, 128, 1>}, {pipeline_mode = #tpu.pipeline_mode<synchronous>, transform_indices = @transform_2, window_bounds = array<i64: 32, 128>}, {pipeline_mode = #tpu.pipeline_mode<synchronous>, transform_indices = @transform_3, window_bounds = array<i64: 1, 128>}, {pipeline_mode = #tpu.pipeline_mode<synchronous>, transform_indices = @transform_4, window_bounds = array<i64: 5, 32, 32>}, {pipeline_mode = #tpu.pipeline_mode<synchronous>, transform_indices = @transform_5, window_bounds = array<i64: 1, 32>}, {pipeline_mode = #tpu.pipeline_mode<synchronous>, transform_indices = @transform_6, window_bounds = array<i64: 2, 32, 128>}, {pipeline_mode = #tpu.pipeline_mode<synchronous>, transform_indices = @transform_7, window_bounds = array<i64: 1, 128>}, {pipeline_mode = #tpu.pipeline_mode<synchronous>, transform_indices = @transform_8, window_bounds = array<i64: 7, 8, 128>}]} {
    %cst = arith.constant 0.000000e+00 : f32
    %0 = vector.broadcast %cst : f32 to vector<16x32xf32>
    %c0 = arith.constant 0 : index
    %c0_0 = arith.constant 0 : index
    %1 = vector.load %arg11[%c0, %c0_0] : memref<16x32xf32, #tpu.memory_space<vmem>>, vector<16x32xf32>
    tpu.vector_store %arg11[%c0, %c0_0], %0 {strides = array<i32>} : memref<16x32xf32, #tpu.memory_space<vmem>>, vector<16x32xf32>,
    %2 = tpu.iota {dimensions = array<i32: 1>} : vector<128x16xi32>
    %c0_i32 = arith.constant 0 : i32
    %c7_i32 = arith.constant 7 : i32
    %3 = arith.addi %c0_i32, %c7_i32 : i32
    %c1_i32 = arith.constant 1 : i32
    scf.for %arg12 = %c0_i32 to %3 step %c1_i32  : i32 {
      %4 = arith.index_cast %arg12 : i32 to index
      %c0_2 = arith.constant 0 : index
      %c0_3 = arith.constant 0 : index
      %5 = vector.load %arg2[%4, %c0_2, %c0_3] : memref<7x8x32xf32, #tpu.memory_space<vmem>>, vector<1x8x32xf32>
      %6 = vector.shape_cast %5 : vector<1x8x32xf32> to vector<8x32xf32>
      %7 = arith.index_cast %arg12 : i32 to index
      %c0_4 = arith.constant 0 : index
      %c0_5 = arith.constant 0 : index
      %8 = vector.load %arg3[%7, %c0_4, %c0_5] : memref<7x128x1xi32, #tpu.memory_space<vmem>>, vector<1x128x1xi32>
      %9 = vector.shape_cast %8 : vector<1x128x1xi32> to vector<128x1xi32>
      %10 = vector.broadcast %9 : vector<128x1xi32> to vector<128x16xi32>
      %11 = arith.cmpi eq, %10, %2 : vector<128x16xi32>
      %12 = arith.extui %11 : vector<128x16xi1> to vector<128x16xi32>
      %13 = arith.sitofp %12 : vector<128x16xi32> to vector<128x16xf32>
      %c0_6 = arith.constant 0 : index
      %c0_7 = arith.constant 0 : index
      %14 = vector.load %arg11[%c0_6, %c0_7] : memref<16x32xf32, #tpu.memory_space<vmem>>, vector<16x32xf32>
      %cst_8 = arith.constant dense<0.000000e+00> : vector<128x32xf32>
      %15 = tpu.matmul %13, %14, %cst_8 {dimension_numbers = #tpu.dot_dimension_numbers<[1], [0], [0], [1], [0, 0, 1, 1], [], []>} : vector<128x16xf32>, vector<16x32xf32>, vector<128x32xf32> -> vector<128x32xf32>
      %16 = vector.extract_strided_slice %15 {offsets = [0, 0], sizes = [64, 32], strides = [1, 1]} : vector<128x32xf32> to vector<64x32xf32>
      %17 = vector.shape_cast %16 : vector<64x32xf32> to vector<8x8x32xf32>
      %18 = vector.extract_strided_slice %15 {offsets = [64, 0], sizes = [64, 32], strides = [1, 1]} : vector<128x32xf32> to vector<64x32xf32>
      %19 = vector.shape_cast %18 : vector<64x32xf32> to vector<8x8x32xf32>
      %cst_9 = arith.constant dense<0.000000e+00> : vector<8x32xf32>
      %20 = vector.multi_reduction <add>, %17, %cst_9 [1] : vector<8x8x32xf32> to vector<8x32xf32>
      %cst_10 = arith.constant dense<0.000000e+00> : vector<8x32xf32>
      %21 = vector.multi_reduction <add>, %19, %cst_10 [1] : vector<8x8x32xf32> to vector<8x32xf32>
      %c0_11 = arith.constant 0 : index
      %c0_12 = arith.constant 0 : index
      %22 = vector.load %arg4[%c0_11, %c0_12] : memref<32x128xf32, #tpu.memory_space<vmem>>, vector<32x128xf32>
      %cst_13 = arith.constant dense<0.000000e+00> : vector<8x128xf32>
      %23 = tpu.matmul %6, %22, %cst_13 {dimension_numbers = #tpu.dot_dimension_numbers<[1], [0], [0], [1], [0, 0, 1, 1], [], []>} : vector<8x32xf32>, vector<32x128xf32>, vector<8x128xf32> -> vector<8x128xf32>
      %c0_14 = arith.constant 0 : index
      %c0_15 = arith.constant 0 : index
      %24 = vector.load %arg5[%c0_14, %c0_15] : memref<1x128xf32, #tpu.memory_space<vmem>>, vector<1x128xf32>
      %25 = vector.broadcast %24 : vector<1x128xf32> to vector<8x128xf32>
      %26 = arith.addf %23, %25 : vector<8x128xf32>
      %27 = vector.extract_strided_slice %26 {offsets = [0, 0], sizes = [8, 32], strides = [1, 1]} : vector<8x128xf32> to vector<8x32xf32>
      %28 = vector.extract_strided_slice %26 {offsets = [0, 32], sizes = [8, 32], strides = [1, 1]} : vector<8x128xf32> to vector<8x32xf32>
      %29 = vector.extract_strided_slice %26 {offsets = [0, 64], sizes = [8, 32], strides = [1, 1]} : vector<8x128xf32> to vector<8x32xf32>
      %30 = vector.extract_strided_slice %26 {offsets = [0, 96], sizes = [8, 32], strides = [1, 1]} : vector<8x128xf32> to vector<8x32xf32>
      %c0_16 = arith.constant 0 : index
      %c0_17 = arith.constant 0 : index
      %c0_18 = arith.constant 0 : index
      %31 = vector.load %arg6[%c0_16, %c0_17, %c0_18] : memref<5x32x32xf32, #tpu.memory_space<vmem>>, vector<1x32x32xf32>
      %32 = vector.shape_cast %31 : vector<1x32x32xf32> to vector<32x32xf32>
      %cst_19 = arith.constant dense<0.000000e+00> : vector<8x32xf32>
      %33 = tpu.matmul %20, %32, %cst_19 {dimension_numbers = #tpu.dot_dimension_numbers<[1], [0], [0], [1], [0, 0, 1, 1], [], []>} : vector<8x32xf32>, vector<32x32xf32>, vector<8x32xf32> -> vector<8x32xf32>
      %34 = arith.addf %27, %33 : vector<8x32xf32>
      %35 = arith.negf %34 : vector<8x32xf32>
      %36 = math.exp %35 : vector<8x32xf32>
      %cst_20 = arith.constant 1.000000e+00 : f32
      %37 = vector.broadcast %cst_20 : f32 to vector<8x32xf32>
      %38 = arith.addf %37, %36 : vector<8x32xf32>
      %39 = arith.divf %37, %38 : vector<8x32xf32>
      %c2 = arith.constant 2 : index
      %c0_21 = arith.constant 0 : index
      %c0_22 = arith.constant 0 : index
      %40 = vector.load %arg6[%c2, %c0_21, %c0_22] : memref<5x32x32xf32, #tpu.memory_space<vmem>>, vector<1x32x32xf32>
      %41 = vector.shape_cast %40 : vector<1x32x32xf32> to vector<32x32xf32>
      %cst_23 = arith.constant dense<0.000000e+00> : vector<64x32xf32>
      %42 = tpu.matmul %16, %41, %cst_23 {dimension_numbers = #tpu.dot_dimension_numbers<[1], [0], [0], [1], [0, 0, 1, 1], [], []>} : vector<64x32xf32>, vector<32x32xf32>, vector<64x32xf32> -> vector<64x32xf32>
      %43 = vector.shape_cast %42 : vector<64x32xf32> to vector<8x8x32xf32>
      %44 = vector.shape_cast %28 : vector<8x32xf32> to vector<8x1x32xf32>
      %45 = vector.broadcast %44 : vector<8x1x32xf32> to vector<8x8x32xf32>
      %46 = arith.addf %45, %43 : vector<8x8x32xf32>
      %47 = arith.negf %46 : vector<8x8x32xf32>
      %48 = math.exp %47 : vector<8x8x32xf32>
      %cst_24 = arith.constant 1.000000e+00 : f32
      %49 = vector.broadcast %cst_24 : f32 to vector<8x8x32xf32>
      %50 = arith.addf %49, %48 : vector<8x8x32xf32>
      %51 = arith.divf %49, %50 : vector<8x8x32xf32>
      %52 = arith.mulf %51, %17 : vector<8x8x32xf32>
      %cst_25 = arith.constant dense<0.000000e+00> : vector<8x32xf32>
      %53 = vector.multi_reduction <add>, %52, %cst_25 [1] : vector<8x8x32xf32> to vector<8x32xf32>
      %c1 = arith.constant 1 : index
      %c0_26 = arith.constant 0 : index
      %c0_27 = arith.constant 0 : index
      %54 = vector.load %arg6[%c1, %c0_26, %c0_27] : memref<5x32x32xf32, #tpu.memory_space<vmem>>, vector<1x32x32xf32>
      %55 = vector.shape_cast %54 : vector<1x32x32xf32> to vector<32x32xf32>
      %cst_28 = arith.constant dense<0.000000e+00> : vector<8x32xf32>
      %56 = tpu.matmul %53, %55, %cst_28 {dimension_numbers = #tpu.dot_dimension_numbers<[1], [0], [0], [1], [0, 0, 1, 1], [], []>} : vector<8x32xf32>, vector<32x32xf32>, vector<8x32xf32> -> vector<8x32xf32>
      %57 = arith.addf %29, %56 : vector<8x32xf32>
      %58 = math.tanh %57 : vector<8x32xf32>
      %cst_29 = arith.constant 1.000000e+00 : f32
      %59 = vector.broadcast %cst_29 : f32 to vector<8x32xf32>
      %60 = arith.subf %59, %39 : vector<8x32xf32>
      %61 = arith.mulf %60, %20 : vector<8x32xf32>
      %62 = arith.mulf %39, %58 : vector<8x32xf32>
      %63 = arith.addf %61, %62 : vector<8x32xf32>
      %c8_i32 = arith.constant 8 : i32
      %64 = arith.muli %arg12, %c8_i32 : i32
      %c0_i32_30 = arith.constant 0 : i32
      %65 = arith.addi %64, %c0_i32_30 : i32
      %66 = arith.index_cast %65 : i32 to index
      %67 = memref.load %arg1[%66] : memref<56xi32, #tpu.memory_space<smem>>
      %c0_i32_31 = arith.constant 0 : i32
      %68 = arith.cmpi sge, %67, %c0_i32_31 : i32
      %69 = arith.extui %68 : i1 to i32
      %c0_i32_32 = arith.constant 0 : i32
      %70 = arith.cmpi ne, %69, %c0_i32_32 : i32
      scf.if %70 {
        %141 = vector.extract_strided_slice %63 {offsets = [0, 0], sizes = [1, 32], strides = [1, 1]} : vector<8x32xf32> to vector<1x32xf32>
        %142 = arith.index_cast %67 : i32 to index
        %c0_71 = arith.constant 0 : index
        %143 = vector.load %arg11[%142, %c0_71] : memref<16x32xf32, #tpu.memory_space<vmem>>, vector<1x32xf32>
        tpu.vector_store %arg11[%142, %c0_71], %141 {strides = array<i32>} : memref<16x32xf32, #tpu.memory_space<vmem>>, vector<1x32xf32>,
      } else {
      }
      %c1_i32_33 = arith.constant 1 : i32
      %71 = arith.addi %64, %c1_i32_33 : i32
      %72 = arith.index_cast %71 : i32 to index
      %73 = memref.load %arg1[%72] : memref<56xi32, #tpu.memory_space<smem>>
      %c0_i32_34 = arith.constant 0 : i32
      %74 = arith.cmpi sge, %73, %c0_i32_34 : i32
      %75 = arith.extui %74 : i1 to i32
      %c0_i32_35 = arith.constant 0 : i32
      %76 = arith.cmpi ne, %75, %c0_i32_35 : i32
      scf.if %76 {
        %141 = vector.extract_strided_slice %63 {offsets = [1, 0], sizes = [1, 32], strides = [1, 1]} : vector<8x32xf32> to vector<1x32xf32>
        %142 = arith.index_cast %73 : i32 to index
        %c0_71 = arith.constant 0 : index
        %143 = vector.load %arg11[%142, %c0_71] : memref<16x32xf32, #tpu.memory_space<vmem>>, vector<1x32xf32>
        tpu.vector_store %arg11[%142, %c0_71], %141 {strides = array<i32>} : memref<16x32xf32, #tpu.memory_space<vmem>>, vector<1x32xf32>,
      } else {
      }
      %c2_i32 = arith.constant 2 : i32
      %77 = arith.addi %64, %c2_i32 : i32
      %78 = arith.index_cast %77 : i32 to index
      %79 = memref.load %arg1[%78] : memref<56xi32, #tpu.memory_space<smem>>
      %c0_i32_36 = arith.constant 0 : i32
      %80 = arith.cmpi sge, %79, %c0_i32_36 : i32
      %81 = arith.extui %80 : i1 to i32
      %c0_i32_37 = arith.constant 0 : i32
      %82 = arith.cmpi ne, %81, %c0_i32_37 : i32
      scf.if %82 {
        %141 = vector.extract_strided_slice %63 {offsets = [2, 0], sizes = [1, 32], strides = [1, 1]} : vector<8x32xf32> to vector<1x32xf32>
        %142 = arith.index_cast %79 : i32 to index
        %c0_71 = arith.constant 0 : index
        %143 = vector.load %arg11[%142, %c0_71] : memref<16x32xf32, #tpu.memory_space<vmem>>, vector<1x32xf32>
        tpu.vector_store %arg11[%142, %c0_71], %141 {strides = array<i32>} : memref<16x32xf32, #tpu.memory_space<vmem>>, vector<1x32xf32>,
      } else {
      }
      %c3_i32 = arith.constant 3 : i32
      %83 = arith.addi %64, %c3_i32 : i32
      %84 = arith.index_cast %83 : i32 to index
      %85 = memref.load %arg1[%84] : memref<56xi32, #tpu.memory_space<smem>>
      %c0_i32_38 = arith.constant 0 : i32
      %86 = arith.cmpi sge, %85, %c0_i32_38 : i32
      %87 = arith.extui %86 : i1 to i32
      %c0_i32_39 = arith.constant 0 : i32
      %88 = arith.cmpi ne, %87, %c0_i32_39 : i32
      scf.if %88 {
        %141 = vector.extract_strided_slice %63 {offsets = [3, 0], sizes = [1, 32], strides = [1, 1]} : vector<8x32xf32> to vector<1x32xf32>
        %142 = arith.index_cast %85 : i32 to index
        %c0_71 = arith.constant 0 : index
        %143 = vector.load %arg11[%142, %c0_71] : memref<16x32xf32, #tpu.memory_space<vmem>>, vector<1x32xf32>
        tpu.vector_store %arg11[%142, %c0_71], %141 {strides = array<i32>} : memref<16x32xf32, #tpu.memory_space<vmem>>, vector<1x32xf32>,
      } else {
      }
      %c4_i32 = arith.constant 4 : i32
      %89 = arith.addi %64, %c4_i32 : i32
      %90 = arith.index_cast %89 : i32 to index
      %91 = memref.load %arg1[%90] : memref<56xi32, #tpu.memory_space<smem>>
      %c0_i32_40 = arith.constant 0 : i32
      %92 = arith.cmpi sge, %91, %c0_i32_40 : i32
      %93 = arith.extui %92 : i1 to i32
      %c0_i32_41 = arith.constant 0 : i32
      %94 = arith.cmpi ne, %93, %c0_i32_41 : i32
      scf.if %94 {
        %141 = vector.extract_strided_slice %63 {offsets = [4, 0], sizes = [1, 32], strides = [1, 1]} : vector<8x32xf32> to vector<1x32xf32>
        %142 = arith.index_cast %91 : i32 to index
        %c0_71 = arith.constant 0 : index
        %143 = vector.load %arg11[%142, %c0_71] : memref<16x32xf32, #tpu.memory_space<vmem>>, vector<1x32xf32>
        tpu.vector_store %arg11[%142, %c0_71], %141 {strides = array<i32>} : memref<16x32xf32, #tpu.memory_space<vmem>>, vector<1x32xf32>,
      } else {
      }
      %c5_i32 = arith.constant 5 : i32
      %95 = arith.addi %64, %c5_i32 : i32
      %96 = arith.index_cast %95 : i32 to index
      %97 = memref.load %arg1[%96] : memref<56xi32, #tpu.memory_space<smem>>
      %c0_i32_42 = arith.constant 0 : i32
      %98 = arith.cmpi sge, %97, %c0_i32_42 : i32
      %99 = arith.extui %98 : i1 to i32
      %c0_i32_43 = arith.constant 0 : i32
      %100 = arith.cmpi ne, %99, %c0_i32_43 : i32
      scf.if %100 {
        %141 = vector.extract_strided_slice %63 {offsets = [5, 0], sizes = [1, 32], strides = [1, 1]} : vector<8x32xf32> to vector<1x32xf32>
        %142 = arith.index_cast %97 : i32 to index
        %c0_71 = arith.constant 0 : index
        %143 = vector.load %arg11[%142, %c0_71] : memref<16x32xf32, #tpu.memory_space<vmem>>, vector<1x32xf32>
        tpu.vector_store %arg11[%142, %c0_71], %141 {strides = array<i32>} : memref<16x32xf32, #tpu.memory_space<vmem>>, vector<1x32xf32>,
      } else {
      }
      %c6_i32 = arith.constant 6 : i32
      %101 = arith.addi %64, %c6_i32 : i32
      %102 = arith.index_cast %101 : i32 to index
      %103 = memref.load %arg1[%102] : memref<56xi32, #tpu.memory_space<smem>>
      %c0_i32_44 = arith.constant 0 : i32
      %104 = arith.cmpi sge, %103, %c0_i32_44 : i32
      %105 = arith.extui %104 : i1 to i32
      %c0_i32_45 = arith.constant 0 : i32
      %106 = arith.cmpi ne, %105, %c0_i32_45 : i32
      scf.if %106 {
        %141 = vector.extract_strided_slice %63 {offsets = [6, 0], sizes = [1, 32], strides = [1, 1]} : vector<8x32xf32> to vector<1x32xf32>
        %142 = arith.index_cast %103 : i32 to index
        %c0_71 = arith.constant 0 : index
        %143 = vector.load %arg11[%142, %c0_71] : memref<16x32xf32, #tpu.memory_space<vmem>>, vector<1x32xf32>
        tpu.vector_store %arg11[%142, %c0_71], %141 {strides = array<i32>} : memref<16x32xf32, #tpu.memory_space<vmem>>, vector<1x32xf32>,
      } else {
      }
      %c7_i32_46 = arith.constant 7 : i32
      %107 = arith.addi %64, %c7_i32_46 : i32
      %108 = arith.index_cast %107 : i32 to index
      %109 = memref.load %arg1[%108] : memref<56xi32, #tpu.memory_space<smem>>
      %c0_i32_47 = arith.constant 0 : i32
      %110 = arith.cmpi sge, %109, %c0_i32_47 : i32
      %111 = arith.extui %110 : i1 to i32
      %c0_i32_48 = arith.constant 0 : i32
      %112 = arith.cmpi ne, %111, %c0_i32_48 : i32
      scf.if %112 {
        %141 = vector.extract_strided_slice %63 {offsets = [7, 0], sizes = [1, 32], strides = [1, 1]} : vector<8x32xf32> to vector<1x32xf32>
        %142 = arith.index_cast %109 : i32 to index
        %c0_71 = arith.constant 0 : index
        %143 = vector.load %arg11[%142, %c0_71] : memref<16x32xf32, #tpu.memory_space<vmem>>, vector<1x32xf32>
        tpu.vector_store %arg11[%142, %c0_71], %141 {strides = array<i32>} : memref<16x32xf32, #tpu.memory_space<vmem>>, vector<1x32xf32>,
      } else {
      }
      %c4 = arith.constant 4 : index
      %c0_49 = arith.constant 0 : index
      %c0_50 = arith.constant 0 : index
      %113 = vector.load %arg6[%c4, %c0_49, %c0_50] : memref<5x32x32xf32, #tpu.memory_space<vmem>>, vector<1x32x32xf32>
      %114 = vector.shape_cast %113 : vector<1x32x32xf32> to vector<32x32xf32>
      %cst_51 = arith.constant dense<0.000000e+00> : vector<8x32xf32>
      %115 = tpu.matmul %63, %114, %cst_51 {dimension_numbers = #tpu.dot_dimension_numbers<[1], [0], [0], [1], [0, 0, 1, 1], [], []>} : vector<8x32xf32>, vector<32x32xf32>, vector<8x32xf32> -> vector<8x32xf32>
      %c0_52 = arith.constant 0 : index
      %c0_53 = arith.constant 0 : index
      %116 = vector.load %arg7[%c0_52, %c0_53] : memref<1x32xf32, #tpu.memory_space<vmem>>, vector<1x32xf32>
      %117 = vector.broadcast %116 : vector<1x32xf32> to vector<8x32xf32>
      %118 = arith.addf %115, %117 : vector<8x32xf32>
      %cst_54 = arith.constant 0.000000e+00 : f32
      %119 = vector.broadcast %cst_54 : f32 to vector<8x32xf32>
      %120 = arith.maximumf %118, %119 : vector<8x32xf32>
      %c3 = arith.constant 3 : index
      %c0_55 = arith.constant 0 : index
      %c0_56 = arith.constant 0 : index
      %121 = vector.load %arg6[%c3, %c0_55, %c0_56] : memref<5x32x32xf32, #tpu.memory_space<vmem>>, vector<1x32x32xf32>
      %122 = vector.shape_cast %121 : vector<1x32x32xf32> to vector<32x32xf32>
      %cst_57 = arith.constant dense<0.000000e+00> : vector<8x32xf32>
      %123 = tpu.matmul %21, %122, %cst_57 {dimension_numbers = #tpu.dot_dimension_numbers<[1], [0], [0], [1], [0, 0, 1, 1], [], []>} : vector<8x32xf32>, vector<32x32xf32>, vector<8x32xf32> -> vector<8x32xf32>
      %124 = arith.addf %30, %123 : vector<8x32xf32>
      %cst_58 = arith.constant 0.000000e+00 : f32
      %125 = vector.broadcast %cst_58 : f32 to vector<8x32xf32>
      %126 = arith.maximumf %124, %125 : vector<8x32xf32>
      %c0_59 = arith.constant 0 : index
      %c0_60 = arith.constant 0 : index
      %c0_61 = arith.constant 0 : index
      %127 = vector.load %arg8[%c0_59, %c0_60, %c0_61] : memref<2x32x128xf32, #tpu.memory_space<vmem>>, vector<1x32x128xf32>
      %128 = vector.shape_cast %127 : vector<1x32x128xf32> to vector<32x128xf32>
      %cst_62 = arith.constant dense<0.000000e+00> : vector<8x128xf32>
      %129 = tpu.matmul %120, %128, %cst_62 {dimension_numbers = #tpu.dot_dimension_numbers<[1], [0], [0], [1], [0, 0, 1, 1], [], []>} : vector<8x32xf32>, vector<32x128xf32>, vector<8x128xf32> -> vector<8x128xf32>
      %c1_63 = arith.constant 1 : index
      %c0_64 = arith.constant 0 : index
      %c0_65 = arith.constant 0 : index
      %130 = vector.load %arg8[%c1_63, %c0_64, %c0_65] : memref<2x32x128xf32, #tpu.memory_space<vmem>>, vector<1x32x128xf32>
      %131 = vector.shape_cast %130 : vector<1x32x128xf32> to vector<32x128xf32>
      %cst_66 = arith.constant dense<0.000000e+00> : vector<8x128xf32>
      %132 = tpu.matmul %126, %131, %cst_66 {dimension_numbers = #tpu.dot_dimension_numbers<[1], [0], [0], [1], [0, 0, 1, 1], [], []>} : vector<8x32xf32>, vector<32x128xf32>, vector<8x128xf32> -> vector<8x128xf32>
      %133 = arith.addf %129, %132 : vector<8x128xf32>
      %c0_67 = arith.constant 0 : index
      %c0_68 = arith.constant 0 : index
      %134 = vector.load %arg9[%c0_67, %c0_68] : memref<1x128xf32, #tpu.memory_space<vmem>>, vector<1x128xf32>
      %135 = vector.broadcast %134 : vector<1x128xf32> to vector<8x128xf32>
      %136 = arith.addf %133, %135 : vector<8x128xf32>
      %137 = arith.index_cast %arg12 : i32 to index
      %c0_69 = arith.constant 0 : index
      %c0_70 = arith.constant 0 : index
      %138 = vector.load %arg10[%137, %c0_69, %c0_70] : memref<7x8x128xf32, #tpu.memory_space<vmem>>, vector<1x8x128xf32>
      %139 = vector.shape_cast %138 : vector<1x8x128xf32> to vector<8x128xf32>
      %140 = vector.shape_cast %136 : vector<8x128xf32> to vector<1x8x128xf32>
      tpu.vector_store %arg10[%137, %c0_69, %c0_70], %140 {strides = array<i32>} : memref<7x8x128xf32, #tpu.memory_space<vmem>>, vector<1x8x128xf32>,
    }
    %c7_i32_1 = arith.constant 7 : i32
    return
  }
  func.func @transform_0(%arg0: i32, %arg1: memref<56xi32, #tpu.memory_space<smem>>) -> (i32, i32, i32) {
    %c0_i32 = arith.constant 0 : i32
    %c0_i32_0 = arith.constant 0 : i32
    %c0_i32_1 = arith.constant 0 : i32
    %c0_i32_2 = arith.constant 0 : i32
    return %c0_i32, %c0_i32_0, %c0_i32_1 : i32, i32, i32
  }
  func.func @transform_1(%arg0: i32, %arg1: memref<56xi32, #tpu.memory_space<smem>>) -> (i32, i32, i32) {
    %c0_i32 = arith.constant 0 : i32
    %c0_i32_0 = arith.constant 0 : i32
    %c0_i32_1 = arith.constant 0 : i32
    %c0_i32_2 = arith.constant 0 : i32
    return %c0_i32, %c0_i32_0, %c0_i32_1 : i32, i32, i32
  }
  func.func @transform_2(%arg0: i32, %arg1: memref<56xi32, #tpu.memory_space<smem>>) -> (i32, i32) {
    %c0_i32 = arith.constant 0 : i32
    %c0_i32_0 = arith.constant 0 : i32
    %c0_i32_1 = arith.constant 0 : i32
    return %c0_i32, %c0_i32_0 : i32, i32
  }
  func.func @transform_3(%arg0: i32, %arg1: memref<56xi32, #tpu.memory_space<smem>>) -> (i32, i32) {
    %c0_i32 = arith.constant 0 : i32
    %c0_i32_0 = arith.constant 0 : i32
    %c0_i32_1 = arith.constant 0 : i32
    return %c0_i32, %c0_i32_0 : i32, i32
  }
  func.func @transform_4(%arg0: i32, %arg1: memref<56xi32, #tpu.memory_space<smem>>) -> (i32, i32, i32) {
    %c0_i32 = arith.constant 0 : i32
    %c0_i32_0 = arith.constant 0 : i32
    %c0_i32_1 = arith.constant 0 : i32
    %c0_i32_2 = arith.constant 0 : i32
    return %c0_i32, %c0_i32_0, %c0_i32_1 : i32, i32, i32
  }
  func.func @transform_5(%arg0: i32, %arg1: memref<56xi32, #tpu.memory_space<smem>>) -> (i32, i32) {
    %c0_i32 = arith.constant 0 : i32
    %c0_i32_0 = arith.constant 0 : i32
    %c0_i32_1 = arith.constant 0 : i32
    return %c0_i32, %c0_i32_0 : i32, i32
  }
  func.func @transform_6(%arg0: i32, %arg1: memref<56xi32, #tpu.memory_space<smem>>) -> (i32, i32, i32) {
    %c0_i32 = arith.constant 0 : i32
    %c0_i32_0 = arith.constant 0 : i32
    %c0_i32_1 = arith.constant 0 : i32
    %c0_i32_2 = arith.constant 0 : i32
    return %c0_i32, %c0_i32_0, %c0_i32_1 : i32, i32, i32
  }
  func.func @transform_7(%arg0: i32, %arg1: memref<56xi32, #tpu.memory_space<smem>>) -> (i32, i32) {
    %c0_i32 = arith.constant 0 : i32
    %c0_i32_0 = arith.constant 0 : i32
    %c0_i32_1 = arith.constant 0 : i32
    return %c0_i32, %c0_i32_0 : i32, i32
  }
  func.func @transform_8(%arg0: i32, %arg1: memref<56xi32, #tpu.memory_space<smem>>) -> (i32, i32, i32) {
    %c0_i32 = arith.constant 0 : i32
    %c0_i32_0 = arith.constant 0 : i32
    %c0_i32_1 = arith.constant 0 : i32
    %c0_i32_2 = arith.constant 0 : i32
    return %c0_i32, %c0_i32_0, %c0_i32_1 : i32, i32, i32
  }
}

</mosaic_0001>

<bundles_post_ra>
// kernel: tpu_custom_call.1
= control target key start
LH: loop header
LB: loop body
LE: loop exit
PB: predicated region body
PF: predicated region fallthrough
CT: control target
= control target key end

     0   :  { %s2557_s0 = inlined_call_operand.vmem [shape: s32[56], index: 0, kind: input, shape index: {}]   ;;  %s2558_s1 = inlined_call_operand.vmem [shape: f32[7,8,32], index: 1, kind: input, shape index: {}]   ;;  %s2559_s2 = inlined_call_operand.vmem [shape: s32[7,128,1], index: 2, kind: input, shape index: {}]   ;;  %s2560_s3 = inlined_call_operand.vmem [shape: f32[32,128], index: 3, kind: input, shape index: {}]   ;;  %s2561_s4 = inlined_call_operand.vmem [shape: f32[1,128], index: 4, kind: input, shape index: {}]   ;;  %s2562_s5 = inlined_call_operand.vmem [shape: f32[5,32,32], index: 5, kind: input, shape index: {}]   ;;  %s2563_s6 = inlined_call_operand.vmem [shape: f32[1,32], index: 6, kind: input, shape index: {}]   ;;  %s2564_s7 = inlined_call_operand.vmem [shape: f32[2,32,128], index: 7, kind: input, shape index: {}]   ;;  %s2565_s8 = inlined_call_operand.vmem [shape: f32[1,128], index: 8, kind: input, shape index: {}]   ;;  %s2566_s9 = inlined_call_operand.hbm [shape: f32[7,8,128], index: 9, kind: output, shape index: {}]  }
   0x1   :  { %s14_s11 = sshll.u32 %s2557_s0, 4  ;;  %s15_s11 = int_to_ptr.vmem [resolvable:$true] %s14_s11 }
   0x2   :  { %s2023_s12 = scalar_lea.vmem %s15_s11, 16  ;;  %p2028_p1 = scmp.lt.s32.totalorder %s15_s11, %s15_s11 }
   0x3   :  { %p2024_p0 = scmp.ne.s32.totalorder %s15_s11, %s2023_s12  ;;  %p2029_p2 = scmp.lt.s32.totalorder %s2023_s12, %s2023_s12 }
   0x5   :  { %p2030_p3 = por %p2029_p2, %p2028_p1 }
   0x7   :  { %p2031_p4 = pnand %p2030_p3, %p2024_p0 }
   0x9   :  { %2034 = shalt.err (!%p2031_p4)  }
   0xa   :  { %s2069_s13 = smov [#allocation4]  }
   0xb   :  { %17 = dma.vmem_to_smem %s15_s11, 16, %s2069_s13, [#allocation3] }
   0xc   :  { %2061 = dma.done.wait [#allocation3], 16 }
   0xd   :  { %2062 = vsyncadd [#allocation3], 4294967280 }
   0xe   :  { %19 = sfence }
   0xf   :  { %20 = vsyncpa [#allocation6], 0  ;;  %vm37_vm0 = vcmask 261120   ;;  %v40_v0 = vlaneseq  ;;  %v2070_v1 = vmov 0.0   ;;  %s2140_s0 = smov 0  }
  0x10   :  { %38 = vst.msk [vmem:[#allocation2] sm:$0xff] %vm37_vm0, %v2070_v1  ;;  %39 = vst.msk [vmem:[#allocation2 + $0x8] sm:$0xff] %vm37_vm0, %v2070_v1 }
  0x11   :  { %v2138_v2 = vand.u32 127, %v40_v0 }
  0x12 LB: > { %v2071_v3 = vmov 0   ;;  %s1630_s14 = sshll.u32 %s2067_s0, 7  ;;  %vm167_vm1 = vcmask 130048   ;;  %v2072_v17 = vmov 0.0   ;;  %v473_v32 = vld [vmem:[%s2560_s3] sm:$0xff]  ;;  %v474_v33 = vld [vmem:[%s2560_s3 + $0x8] sm:$0xff]  ;;  %s2067_s0 = sphi %s2140_s0, %s47_s0  }
  0x13   : > { %1984 = vset.pattern.permute.xlu1 %v2071_v3  ;;  %1983 = vset.pattern.permute.xlu0 %v2071_v3  ;;  %s2149_s17 = scalar_lea.vmem %s2559_s2, %s1630_s14  ;;  %v1913_v34 = vpack.c.bf16 %v474_v33, %v473_v32  ;;  %v2073_v35 = vmov 0.0|0.0   ;;  %v475_v36 = vld [vmem:[%s2560_s3 + $0x10] sm:$0xff]  ;;  %v476_v37 = vld [vmem:[%s2560_s3 + $0x18] sm:$0xff]  ;;  %s2199_s26 = sshll.u32 %s2067_s0, 3  ;;  %v557_v39 = vld [vmem:[%s2562_s5] sm:$0xff]  ;;  %vm2074_vm10 = vmmov 0  }
  0x14   : > { %v55_v4 = vld [vmem:[%s2149_s17 + $0x10] sm:$0xff]  ;;  %v53_v5 = vld [vmem:[%s2149_s17] sm:$0xff]  ;;  %v56_v6 = vld [vmem:[%s2149_s17 + $0x18] sm:$0xff]  ;;  %1912 = vmatprep.subr.bf16.mxu1 %v2073_v35  ;;  %v1916_v38 = vpack.c.bf16 %v476_v37, %v475_v36  ;;  %s49_s29 = scalar_lea.vmem %s2558_s1, %s2199_s26  ;;  %1819 = vmatprep.mubr.msk.f32.mxu1 %vm2074_vm10, %v2072_v17  ;;  %s2225_s18 = sld [smem:[#allocation4 + %s2199_s26]]  ;;  %vm569_vm11 = vcmask 1041409   ;;  %vm571_vm12 = vcmask 1042434  }
  0x15   : > { %76 = vperm.xlu1 %1984, %v55_v4   ;;  %70 = vperm.xlu0 %1983, %v53_v5   ;;  %v54_v7 = vld [vmem:[%s2149_s17 + $0x8] sm:$0xff]  ;;  %v57_v12 = vld [vmem:[%s2149_s17 + $0x20] sm:$0xff]  ;;  %v60_v13 = vld [vmem:[%s2149_s17 + $0x38] sm:$0xff]  ;;  %vm573_vm13 = vcmask 1043459   ;;  %vm575_vm14 = vcmask 1044484   ;;  %vm577_vm15 = vcmask 1045509  }
  0x16   : > { %v58_v11 = vld [vmem:[%s2149_s17 + $0x28] sm:$0xff]  ;;  %v59_v14 = vld [vmem:[%s2149_s17 + $0x30] sm:$0xff]  ;;  %1914 = vmatpush3.bf16.msra.mxu1 %v1913_v34  ;;  %v50_v41 = vld [vmem:[%s49_s29] sm:$0xff]  ;;  %s2075_s28 = smov 32   ;;  %s2077_s19 = smov 96  }
  0x17   : > { %v165_v8 = vld [vmem:[#allocation2] sm:$0xff]  ;;  %v166_v9 = vld [vmem:[#allocation2 + $0x8] sm:$0xff]  ;;  %1915 = vmatprep.subr.bf16.mxu1 %v2073_v35  ;;  %v559_v43 = vld [vmem:[%s2562_s5 + $0x10] sm:$0xff]  ;;  %s2078_s20 = smov 64  }
  0x18   : > { %v1908_v10 = vpack.c.bf16 %v166_v9, %v165_v8  ;;  %v558_v40 = vld [vmem:[%s2562_s5 + $0x8] sm:$0xff]  ;;  %v560_v44 = vld [vmem:[%s2562_s5 + $0x18] sm:$0xff]  ;;  %v1667_v46 = vld [vmem:[%s2562_s5 + $0x40] sm:$0xff] }
  0x19   : > { %79 = vperm.xlu1 %1984, %v56_v6   ;;  %73 = vperm.xlu0 %1983, %v54_v7   ;;  %v1919_v42 = vpack.c.bf16 %v558_v40, %v557_v39  ;;  %v1922_v45 = vpack.c.bf16 %v560_v44, %v559_v43  ;;  %v1668_v47 = vld [vmem:[%s2562_s5 + $0x48] sm:$0xff] }
  0x1a   : > { %1909 = vmatprep.subr.bf16.mxu0 %v1908_v10  ;;  %1917 = vmatpush3.bf16.msra.mxu1 %v1916_v38  ;;  %v2233_v48 = vpack.c.bf16 %v1668_v47, %v1667_v46  ;;  %p1692_p5 = scmp.lt.s32.totalorder %s2225_s18, 0 }
  0x1b   : > { %1911 = vmatpush3.bf16.msra.mxu0 %v1908_v10  ;;  %1918 = vmatprep.subr.bf16.mxu1 %v2073_v35  ;;  %s1177_s21 = scalar_lea.vmem (!%p1692_p5), [#allocation2], %s2225_s18 }
  0x1c   : > { %1932 = vmatprep.subr.bf16.mxu0 %v2073_v35 }
  0x1d   : > { %85 = vperm.xlu1 %1984, %v58_v11   ;;  %82 = vperm.xlu0 %1983, %v57_v12  }
  0x1e   : > { %1820 = vmatmul.mubr.msk.f32.vlgmr.msra.gmra.mrb[0].mxu1 %vm37_vm0, %v50_v41 }
  0x1f   : > { %1920 = vmatpush3.bf16.msra.mxu1 %v1919_v42  ;;  %1830 = vmatprep.mubr.msk.f32.mxu1 %vm2074_vm10, %v2072_v17 }
  0x20   : > { %1921 = vmatprep.subr.bf16.mxu1 %v2073_v35 }
  0x21   : > { %91 = vperm.xlu1 %1984, %v60_v13   ;;  %88 = vperm.xlu0 %1983, %v59_v14  }
  0x23   : > { %1923 = vmatpush3.bf16.msra.mxu1 %v1922_v45 }
  0x24   : > { %1925 = vmatprep.subr.bf16.mxu1 %v2233_v48 }
  0x94   : > { %v77_v15 = vpop.permute.xlu1 %76  ;;  %v71_v16 = vpop.permute.xlu0 %70 }
  0x95   : > { %vm117_vm2 = vcmp.eq.s32.totalorder %v71_v16, %v2138_v2  ;;  %vm119_vm3 = vcmp.eq.s32.totalorder %v77_v15, %v2138_v2 }
  0x96   : > { %v1631_v18 = vsel %vm117_vm2, 1.0, %v2072_v17  ;;  %v1633_v21 = vsel %vm119_vm3, 1.0, %v2072_v17  ;;  %vm579_vm2 = vcmask 1046534   ;;  %vm581_vm3 = vcmask 1047559  }
  0x97   : > { %1787 = vmatprep.mubr.msk.f32.mxu0 %vm167_vm1, %v1631_v18 }
  0x98   : > { %v80_v19 = vpop.permute.xlu1 %79  ;;  %v74_v20 = vpop.permute.xlu0 %73 }
  0x99   : > { %vm118_vm4 = vcmp.eq.s32.totalorder %v74_v20, %v2138_v2  ;;  %vm120_vm5 = vcmp.eq.s32.totalorder %v80_v19, %v2138_v2 }
  0x9a   : > { %v1632_v22 = vsel %vm118_vm4, 1.0, %v2072_v17  ;;  %v1634_v25 = vsel %vm120_vm5, 1.0, %v2072_v17  ;;  %vm1006_vm4 = vcmask 523520  }
  0x9b   : > { %1788 = vmatmul.mubr.msk.f32.vlgmr.msra.gmra.mrb[0].mxu0 %vm167_vm1, %v1632_v22 }
  0x9c   : > { %v86_v23 = vpop.permute.xlu1 %85  ;;  %1790 = vmatprep.mubr.msk.f32.mxu0 %vm167_vm1, %v1633_v21  ;;  %v83_v24 = vpop.permute.xlu0 %82 }
  0x9d   : > { %vm121_vm6 = vcmp.eq.s32.totalorder %v83_v24, %v2138_v2  ;;  %vm122_vm7 = vcmp.eq.s32.totalorder %v86_v23, %v2138_v2 }
  0x9e   : > { %v1635_v26 = vsel %vm121_vm6, 1.0, %v2072_v17  ;;  %v1636_v29 = vsel %vm122_vm7, 1.0, %v2072_v17 }
  0x9f   : > { %1791 = vmatmul.mubr.msk.f32.gmra.mrb[2].mxu0 %vm167_vm1, %v1634_v25 }
  0xa0   : > { %v92_v27 = vpop.permute.xlu1 %91  ;;  %1793 = vmatprep.mubr.msk.f32.mxu0 %vm167_vm1, %v1635_v26  ;;  %v89_v28 = vpop.permute.xlu0 %88 }
  0xa1   : > { %vm123_vm8 = vcmp.eq.s32.totalorder %v89_v28, %v2138_v2  ;;  %vm124_vm9 = vcmp.eq.s32.totalorder %v92_v27, %v2138_v2 }
  0xa2   : > { %v1637_v30 = vsel %vm123_vm8, 1.0, %v2072_v17  ;;  %v1638_v31 = vsel %vm124_vm9, 1.0, %v2072_v17 }
  0xa3   : > { %1794 = vmatmul.mubr.msk.f32.gmra.mrb[4].mxu0 %vm167_vm1, %v1636_v29 }
  0xa4   : > { %1796 = vmatprep.mubr.msk.f32.mxu0 %vm167_vm1, %v1637_v30 }
  0xa7   : > { %1797 = vmatmul.mubr.msk.f32.gmra.mrb[6].mxu0 %vm167_vm1, %v1638_v31 }
 0x16e   : > { %v2236_v49 = vpop.f32.mrb[0].mxu0 }
 0x16f   : > { %v368_v50 = vsel %vm37_vm0, %v2236_v49, 0.0  ;;  %v2240_v51 = vpop.f32.mrb[1].mxu0 }
 0x170   : > { %v369_v52 = vrot.slane %v368_v50, 4  ;;  %v361_v53 = vsel %vm37_vm0, %v2240_v51, 0.0 }
 0x171   : > { %v362_v54 = vrot.slane %v361_v53, 4 }
 0x172   : > { %v370_v55 = vadd.f32 %v369_v52, %v368_v50  ;;  %v2244_v56 = vpop.f32.mrb[2].mxu0 }
 0x173   : > { %v363_v57 = vadd.f32 %v362_v54, %v361_v53  ;;  %v382_v58 = vsel %vm37_vm0, %v2244_v56, 0.0  ;;  %v2248_v59 = vpop.f32.mrb[3].mxu0 }
 0x174   : > { %v371_v60 = vrot.slane %v370_v55, 2  ;;  %v383_v61 = vrot.slane %v382_v58, 4  ;;  %v375_v62 = vsel %vm37_vm0, %v2248_v59, 0.0 }
 0x175   : > { %v364_v63 = vrot.slane %v363_v57, 2  ;;  %v376_v1 = vrot.slane %v375_v62, 4 }
 0x176   : > { %v372_v3 = vadd.f32 %v371_v60, %v370_v55  ;;  %v384_v4 = vadd.f32 %v383_v61, %v382_v58  ;;  %v2252_v5 = vpop.f32.mrb[4].mxu0  ;;  %v1669_v61 = vld [vmem:[%s2562_s5 + $0x50] sm:$0xff] }
 0x177   : > { %v365_v6 = vadd.f32 %v364_v63, %v363_v57  ;;  %v377_v7 = vadd.f32 %v376_v1, %v375_v62  ;;  %v396_v8 = vsel %vm37_vm0, %v2252_v5, 0.0  ;;  %v2256_v9 = vpop.f32.mrb[5].mxu0  ;;  %v1670_v62 = vld [vmem:[%s2562_s5 + $0x58] sm:$0xff] }
 0x178   : > { %v373_v10 = vrot.slane %v372_v3, 1  ;;  %v385_v11 = vrot.slane %v384_v4, 2  ;;  %v397_v12 = vrot.slane %v396_v8, 4  ;;  %v389_v13 = vsel %vm37_vm0, %v2256_v9, 0.0 }
 0x179   : > { %v366_v14 = vrot.slane %v365_v6, 1  ;;  %v378_v15 = vrot.slane %v377_v7, 2  ;;  %v390_v16 = vrot.slane %v389_v13, 4 }
 0x17a   : > { %v374_v18 = vadd.f32 %v373_v10, %v372_v3  ;;  %v386_v19 = vadd.f32 %v385_v11, %v384_v4  ;;  %v398_v20 = vadd.f32 %v397_v12, %v396_v8  ;;  %v2260_v21 = vpop.f32.mrb[6].mxu0  ;;  %v1928_v4 = vpack.c.bf16 %v1670_v62, %v1669_v61 }
 0x17b   : > { %v367_v22 = vadd.f32 %v366_v14, %v365_v6  ;;  %v379_v23 = vadd.f32 %v378_v15, %v377_v7  ;;  %v391_v24 = vadd.f32 %v390_v16, %v389_v13  ;;  %v410_v25 = vsel %vm37_vm0, %v2260_v21, 0.0  ;;  %v2264_v26 = vpop.f32.mrb[7].mxu0 }
 0x17c   : > { %v387_v27 = vrot.slane %v386_v19, 1  ;;  %v399_v28 = vrot.slane %v398_v20, 2  ;;  %v411_v29 = vrot.slane %v410_v25, 4  ;;  %v403_v30 = vsel %vm37_vm0, %v2264_v26, 0.0 }
 0x17d   : > { %v570_v31 = vsel %vm569_vm11, %v374_v18, %v367_v22  ;;  %v380_v32 = vrot.slane %v379_v23, 1  ;;  %v392_v33 = vrot.slane %v391_v24, 2  ;;  %v404_v34 = vrot.slane %v403_v30, 4  ;;  %v67_v22 = vld [vmem:[%s2149_s17 + $0x70] sm:$0xff] }
 0x17e   : > { %v400_v36 = vadd.f32 %v399_v28, %v398_v20  ;;  %v412_v37 = vadd.f32 %v411_v29, %v410_v25  ;;  %v388_v41 = vadd.f32 %v387_v27, %v386_v19  ;;  %v65_v20 = vld [vmem:[%s2149_s17 + $0x60] sm:$0xff]  ;;  %v2076_v28 = vmov 1966171168  }
 0x17f   : > { %v381_v38 = vadd.f32 %v380_v32, %v379_v23  ;;  %v393_v39 = vadd.f32 %v392_v33, %v391_v24  ;;  %v405_v40 = vadd.f32 %v404_v34, %v403_v30  ;;  %v1688_v23 = vld [vmem:[%s2562_s5 + $0x28] sm:$0xff]  ;;  %v1689_v24 = vld [vmem:[%s2562_s5 + $0x30] sm:$0xff]  ;;  %v799_v29 = vunpack.c.l.s4 %v2076_v28  ;;  %v1663_v32 = vld [vmem:[%s2561_s4] ss:$0 sm:$0xff] }
 0x180   : > { %v401_v42 = vrot.slane %v400_v36, 1  ;;  %v413_v43 = vrot.slane %v412_v37, 2 }
 0x181   : > { %v572_v44 = vsel %vm571_vm12, %v381_v38, %v570_v31  ;;  %v394_v45 = vrot.slane %v393_v39, 1  ;;  %v406_v46 = vrot.slane %v405_v40, 2  ;;  %v800_v30 = vunpack.c.0.s8 %v799_v29 }
 0x182   : > { %v414_v47 = vadd.f32 %v413_v43, %v412_v37  ;;  %v574_v50 = vsel %vm573_vm13, %v388_v41, %v572_v44  ;;  %v402_v54 = vadd.f32 %v401_v42, %v400_v36  ;;  %v802_v31 = vshrl.u32 %v40_v0, 7 }
 0x183   : > { %v395_v52 = vadd.f32 %v394_v45, %v393_v39  ;;  %v407_v53 = vadd.f32 %v406_v46, %v405_v40 }
 0x184   : > { %v415_v55 = vrot.slane %v414_v47, 1  ;;  %v803_v34 = vsub.s32 %v800_v30, %v802_v31  ;;  %v848_v41 = vsub.s32 0, %v802_v31 }
 0x185   : > { %v408_v57 = vrot.slane %v407_v53, 1  ;;  %v576_v58 = vsel %vm575_vm14, %v395_v52, %v574_v50 }
 0x186   : > { %v578_v60 = vsel %vm577_vm15, %v402_v54, %v576_v58  ;;  %v416_v1 = vadd.f32 %v415_v55, %v414_v47 }
 0x187   : > { %v409_v63 = vadd.f32 %v408_v57, %v407_v53 }
 0x189   : > { %v580_v3 = vsel %vm579_vm2, %v409_v63, %v578_v60 }
 0x18a   : > { %v2281_v6 = vsel %vm581_vm3, %v416_v1, %v580_v3 }
 0x18b   : > { %1831 = vmatmul.mubr.msk.f32.vlgmr.msra.gmra.mrb[2].mxu1 %vm37_vm0, %v2281_v6 }
 0x18c   : > { %1927 = vmatpush3.bf16.msra.mxu1 %v2233_v48  ;;  %1841 = vmatprep.mubr.msk.f32.mxu1 %vm37_vm0, %v2240_v51  ;;  %v553_v48 = vpop.f32.mrb[0].mxu1 }
 0x18d   : > { %1929 = vmatprep.subr.bf16.mxu1 %v1928_v4  ;;  %v1821_v7 = vpop.f32.mrb[1].mxu1  ;;  %v2353_v33 = vadd.f32 %v1663_v32, %v553_v48 }
 0x18f   : > { %v804_v36 = vrot.slane %v2353_v33, %v803_v34  ;;  %v797_v37 = vcombine.high %v2353_v33, %v2353_v33 }
 0x190   : > { %1931 = vmatpush3.bf16.msra.mxu1 %v1928_v4 }
 0x191   : > { %v812_v38 = vcombine.high %v804_v36, %v804_v36  ;;  %v811_v40 = vrot.slane %v797_v37, %v803_v34  ;;  %v820_v42 = vrot.slane %v804_v36, %v803_v34 }
 0x193   : > { %1842 = vmatmul.mubr.msk.f32.vlgmr.msra.gmra.mrb[4].mxu1 %vm37_vm0, %v2236_v49  ;;  %v834_v39 = vrot.slane %v812_v38, %v803_v34  ;;  %v813_v45 = vcombine.high %v811_v40, %v811_v40  ;;  %v849_v47 = vrot.slane %v820_v42, %v848_v41  ;;  %v842_v50 = vcombine.high %v820_v42, %v820_v42 }
 0x194   : > { %1844 = vmatprep.mubr.msk.f32.mxu1 %vm37_vm0, %v2248_v59  ;;  %v827_v63 = vrot.slane %v811_v40, %v803_v34 }
 0x195   : > { %v853_v43 = vrot.slane %v834_v39, %v848_v41  ;;  %v844_v44 = vcombine.high %v834_v39, %v834_v39  ;;  %v841_v58 = vrot.slane %v813_v45, %v803_v34  ;;  %v857_v62 = vrot.slane %v842_v50, %v848_v41 }
 0x197   : > { %1845 = vmatmul.mubr.msk.f32.gmra.mrb[6].mxu1 %vm37_vm0, %v2244_v56  ;;  %v861_v57 = vrot.slane %v844_v44, %v848_v41  ;;  %v869_v7 = vrot.slane %v841_v58, %v848_v41 }
 0x198   : > { %1847 = vmatprep.mubr.msk.f32.mxu1 %vm37_vm0, %v2256_v9 }
 0x19b   : > { %1848 = vmatmul.mubr.msk.f32.gmra.mrb[8].mxu1 %vm37_vm0, %v2252_v5 }
 0x19c   : > { %1850 = vmatprep.mubr.msk.f32.mxu1 %vm37_vm0, %v2264_v26 }
 0x19f   : > { %1851 = vmatmul.mubr.msk.f32.gmra.mrb[10].mxu1 %vm37_vm0, %v2260_v21 }
 0x25e   : > { %v2302_v8 = vpop.f32.mrb[2].mxu1 }
 0x25f   : > { %v1832_v10 = vpop.f32.mrb[3].mxu1 }
 0x260   : > { %v845_v10 = vcombine.high %v841_v58, %v841_v58 }
 0x266   : > { %v1843_v11 = vpop.f32.mrb[4].mxu1 }
 0x267   : > { %896 = vrot.lane.b32.xlu1 %v1843_v11, %s2075_s28  ;;  %v757_v12 = vpop.f32.mrb[5].mxu1 }
 0x268   : > { %894 = vrot.lane.b32.xlu0 %v757_v12, %s2075_s28 }
 0x26a   : > { %v1846_v13 = vpop.f32.mrb[6].mxu1 }
 0x26b   : > { %900 = vrot.lane.b32.xlu1 %v1846_v13, %s2075_s28  ;;  %v767_v14 = vpop.f32.mrb[7].mxu1  ;;  %v865_v13 = vrot.slane %v827_v63, %v848_v41 }
 0x26c   : > { %898 = vrot.lane.b32.xlu0 %v767_v14, %s2075_s28  ;;  %v843_v14 = vcombine.high %v827_v63, %v827_v63 }
 0x26e   : > { %v1849_v15 = vpop.f32.mrb[8].mxu1 }
 0x26f   : > { %904 = vrot.lane.b32.xlu1 %v1849_v15, %s2075_s28  ;;  %v777_v16 = vpop.f32.mrb[9].mxu1 }
 0x270   : > { %902 = vrot.lane.b32.xlu0 %v777_v16, %s2075_s28 }
 0x272   : > { %v1852_v18 = vpop.f32.mrb[10].mxu1 }
 0x273   : > { %908 = vrot.lane.b32.xlu1 %v1852_v18, %s2075_s28  ;;  %v787_v19 = vpop.f32.mrb[11].mxu1 }
 0x274   : > { %906 = vrot.lane.b32.xlu0 %v787_v19, %s2075_s28 }
 0x277   : > { %976 = vrot.lane.b32.xlu1 %v2236_v49, %s2075_s28  ;;  %v62_v49 = vld [vmem:[%s2149_s17 + $0x48] sm:$0xff] }
 0x278   : > { %974 = vrot.lane.b32.xlu0 %v2240_v51, %s2075_s28  ;;  %v61_v51 = vld [vmem:[%s2149_s17 + $0x40] sm:$0xff] }
 0x27b   : > { %980 = vrot.lane.b32.xlu1 %v2244_v56, %s2075_s28  ;;  %v64_v56 = vld [vmem:[%s2149_s17 + $0x58] sm:$0xff] }
 0x27c   : > { %978 = vrot.lane.b32.xlu0 %v2248_v59, %s2075_s28  ;;  %v63_v59 = vld [vmem:[%s2149_s17 + $0x50] sm:$0xff] }
 0x27f   : > { %984 = vrot.lane.b32.xlu1 %v2252_v5, %s2075_s28  ;;  %v66_v5 = vld [vmem:[%s2149_s17 + $0x68] sm:$0xff] }
 0x280   : > { %982 = vrot.lane.b32.xlu0 %v2256_v9, %s2075_s28  ;;  %v68_v9 = vld [vmem:[%s2149_s17 + $0x78] sm:$0xff] }
 0x283   : > { %988 = vrot.lane.b32.xlu1 %v2260_v21, %s2075_s28  ;;  %v1687_v21 = vld [vmem:[%s2562_s5 + $0x20] sm:$0xff] }
 0x284   : > { %986 = vrot.lane.b32.xlu0 %v2264_v26, %s2075_s28  ;;  %v1933_v25 = vpack.c.bf16 %v1688_v23, %v1687_v21  ;;  %v1690_v26 = vld [vmem:[%s2562_s5 + $0x38] sm:$0xff] }
 0x285   : > { %v1936_v27 = vpack.c.bf16 %v1690_v26, %v1689_v24 }
 0x286   : > { %1934 = vmatpush3.bf16.msra.mxu0 %v1933_v25 }
 0x287   : > { %97 = vperm.xlu1 %1984, %v62_v49   ;;  %1935 = vmatprep.subr.bf16.mxu0 %v2073_v35  ;;  %v877_v49 = vrot.slane %v845_v10, %v848_v41 }
 0x288   : > { %94 = vperm.xlu0 %1983, %v61_v51  }
 0x28a   : > { %1937 = vmatpush3.bf16.msra.mxu0 %v1936_v27 }
 0x28b   : > { %103 = vperm.xlu1 %1984, %v64_v56  }
 0x28c   : > { %100 = vperm.xlu0 %1983, %v63_v59   ;;  %v873_v59 = vrot.slane %v843_v14, %v848_v41 }
 0x28f   : > { %109 = vperm.xlu1 %1984, %v66_v5  }
 0x290   : > { %106 = vperm.xlu0 %1983, %v65_v20  }
 0x293   : > { %115 = vperm.xlu1 %1984, %v68_v9  }
 0x294   : > { %112 = vperm.xlu0 %1983, %v67_v22  }
 0x2d9   : > { %v897_v46 = vpop.permute.xlu1 %896 }
 0x2da   : > { %v919_v52 = vadd.f32 %v897_v46, %v853_v43  ;;  %v895_v53 = vpop.permute.xlu0 %894 }
 0x2db   : > { %v918_v54 = vadd.f32 %v895_v53, %v849_v47 }
 0x2dc   : > { %v1680_v55 = vmul.f32 -1.442695, %v919_v52 }
 0x2dd   : > { %v1679_v60 = vmul.f32 -1.442695, %v918_v54  ;;  %v901_v61 = vpop.permute.xlu1 %900 }
 0x2de   : > { %1985 = vpow2.f32 %v1680_v55  ;;  %v921_v1 = vadd.f32 %v901_v61, %v861_v57  ;;  %v899_v3 = vpop.permute.xlu0 %898 }
 0x2df   : > { %1987 = vpow2.f32 %v1679_v60  ;;  %v920_v4 = vadd.f32 %v899_v3, %v857_v62 }
 0x2e0   : > { %v1682_v48 = vmul.f32 -1.442695, %v921_v1 }
 0x2e1   : > { %v1681_v11 = vmul.f32 -1.442695, %v920_v4  ;;  %v905_v12 = vpop.permute.xlu1 %904 }
 0x2e2   : > { %1989 = vpow2.f32 %v1682_v48  ;;  %v923_v15 = vadd.f32 %v905_v12, %v869_v7  ;;  %v903_v16 = vpop.permute.xlu0 %902 }
 0x2e3   : > { %1991 = vpow2.f32 %v1681_v11  ;;  %v922_v18 = vadd.f32 %v903_v16, %v865_v13 }
 0x2e4   : > { %v1684_v19 = vmul.f32 -1.442695, %v923_v15 }
 0x2e5   : > { %v1683_v51 = vmul.f32 -1.442695, %v922_v18  ;;  %v909_v56 = vpop.permute.xlu1 %908 }
 0x2e6   : > { %1993 = vpow2.f32 %v1684_v19  ;;  %v925_v5 = vadd.f32 %v909_v56, %v877_v49  ;;  %v907_v20 = vpop.permute.xlu0 %906 }
 0x2e7   : > { %1995 = vpow2.f32 %v1683_v51  ;;  %v924_v9 = vadd.f32 %v907_v20, %v873_v59 }
 0x2e8   : > { %v1986_v22 = vpop.eup %1985  ;;  %v1686_v21 = vmul.f32 -1.442695, %v925_v5 }
 0x2e9   : > { %v1988_v23 = vpop.eup %1987  ;;  %v951_v24 = vadd.f32 1.0, %v1986_v22  ;;  %v1685_v25 = vmul.f32 -1.442695, %v924_v9  ;;  %v977_v31 = vpop.permute.xlu1 %976 }
 0x2ea   : > { %v950_v26 = vadd.f32 1.0, %v1988_v23  ;;  %1997 = vpow2.f32 %v1686_v21  ;;  %v975_v37 = vpop.permute.xlu0 %974 }
 0x2eb   : > { %1999 = vrcp.f32 %v951_v24 }
 0x2ec   : > { %v1990_v27 = vpop.eup %1989  ;;  %2001 = vrcp.f32 %v950_v26 }
 0x2ed   : > { %v1992_v28 = vpop.eup %1991  ;;  %v953_v29 = vadd.f32 1.0, %v1990_v27  ;;  %2003 = vpow2.f32 %v1685_v25  ;;  %v981_v42 = vpop.permute.xlu1 %980 }
 0x2ee   : > { %v952_v30 = vadd.f32 1.0, %v1992_v28  ;;  %v979_v47 = vpop.permute.xlu0 %978 }
 0x2ef   : > { %2005 = vrcp.f32 %v953_v29 }
 0x2f0   : > { %v1994_v32 = vpop.eup %1993  ;;  %2007 = vrcp.f32 %v952_v30 }
 0x2f1   : > { %v1996_v34 = vpop.eup %1995  ;;  %v955_v36 = vadd.f32 1.0, %v1994_v32  ;;  %v985_v63 = vpop.permute.xlu1 %984 }
 0x2f2   : > { %v954_v38 = vadd.f32 1.0, %v1996_v34  ;;  %v983_v11 = vpop.permute.xlu0 %982 }
 0x2f3   : > { %2009 = vrcp.f32 %v955_v36 }
 0x2f4   : > { %v1998_v39 = vpop.eup %1997  ;;  %2011 = vrcp.f32 %v954_v38 }
 0x2f5   : > { %v2000_v40 = vpop.eup %1999  ;;  %v957_v41 = vadd.f32 1.0, %v1998_v39  ;;  %v989_v21 = vpop.permute.xlu1 %988 }
 0x2f6   : > { %v2002_v43 = vpop.eup %2001  ;;  %v999_v44 = vmul.f32 %v2000_v40, %v977_v31  ;;  %v987_v28 = vpop.permute.xlu0 %986 }
 0x2f7   : > { %v2004_v45 = vpop.eup %2003  ;;  %2013 = vrcp.f32 %v957_v41  ;;  %v998_v46 = vmul.f32 %v2002_v43, %v975_v37 }
 0x2f8   : > { %v956_v50 = vadd.f32 1.0, %v2004_v45  ;;  %v1014_v52 = vsel %vm1006_vm4, %v999_v44, 0.0 }
 0x2f9   : > { %v2006_v53 = vpop.eup %2005  ;;  %v1015_v54 = vrot.slane %v1014_v52, 4  ;;  %v1007_v55 = vsel %vm1006_vm4, %v998_v46, 0.0 }
 0x2fa   : > { %v2008_v57 = vpop.eup %2007  ;;  %2015 = vrcp.f32 %v956_v50  ;;  %v1008_v58 = vrot.slane %v1007_v55, 4  ;;  %v1001_v60 = vmul.f32 %v2006_v53, %v981_v42 }
 0x2fb   : > { %v1016_v61 = vadd.f32 %v1015_v54, %v1014_v52  ;;  %v1000_v62 = vmul.f32 %v2008_v57, %v979_v47 }
 0x2fc   : > { %v1009_v1 = vadd.f32 %v1008_v58, %v1007_v55  ;;  %v1028_v3 = vsel %vm1006_vm4, %v1001_v60, 0.0 }
 0x2fd   : > { %v2010_v4 = vpop.eup %2009  ;;  %v1017_v48 = vrot.slane %v1016_v61, 2  ;;  %v1029_v7 = vrot.slane %v1028_v3, 4  ;;  %v1021_v10 = vsel %vm1006_vm4, %v1000_v62, 0.0 }
 0x2fe   : > { %v2012_v12 = vpop.eup %2011  ;;  %v1010_v13 = vrot.slane %v1009_v1, 2  ;;  %v1022_v14 = vrot.slane %v1021_v10, 4  ;;  %v1003_v15 = vmul.f32 %v2010_v4, %v985_v63 }
 0x2ff   : > { %v1018_v16 = vadd.f32 %v1017_v48, %v1016_v61  ;;  %v1030_v18 = vadd.f32 %v1029_v7, %v1028_v3  ;;  %v1002_v19 = vmul.f32 %v2012_v12, %v983_v11 }
 0x300   : > { %v1011_v49 = vadd.f32 %v1010_v13, %v1009_v1  ;;  %v1023_v51 = vadd.f32 %v1022_v14, %v1021_v10  ;;  %v1042_v56 = vsel %vm1006_vm4, %v1003_v15, 0.0 }
 0x301   : > { %v2014_v59 = vpop.eup %2013  ;;  %v1019_v5 = vrot.slane %v1018_v16, 1  ;;  %v1031_v20 = vrot.slane %v1030_v18, 2  ;;  %v1043_v9 = vrot.slane %v1042_v56, 4  ;;  %v1035_v22 = vsel %vm1006_vm4, %v1002_v19, 0.0 }
 0x302   : > { %v1012_v23 = vrot.slane %v1011_v49, 1  ;;  %v1024_v24 = vrot.slane %v1023_v51, 2  ;;  %v1036_v25 = vrot.slane %v1035_v22, 4  ;;  %v1005_v26 = vmul.f32 %v2014_v59, %v989_v21 }
 0x303   : > { %v1044_v27 = vadd.f32 %v1043_v9, %v1042_v56  ;;  %v1032_v34 = vadd.f32 %v1031_v20, %v1030_v18  ;;  %v1020_v39 = vadd.f32 %v1019_v5, %v1018_v16 }
 0x304   : > { %v2016_v29 = vpop.eup %2015  ;;  %v1025_v30 = vadd.f32 %v1024_v24, %v1023_v51  ;;  %v1037_v31 = vadd.f32 %v1036_v25, %v1035_v22  ;;  %v1056_v32 = vsel %vm1006_vm4, %v1005_v26, 0.0  ;;  %v1013_v40 = vadd.f32 %v1012_v23, %v1011_v49 }
 0x305   : > { %v1045_v36 = vrot.slane %v1044_v27, 2  ;;  %v1057_v37 = vrot.slane %v1056_v32, 4  ;;  %v1004_v38 = vmul.f32 %v2016_v29, %v987_v28  ;;  %v1033_v53 = vrot.slane %v1032_v34, 1 }
 0x306   : > { %v1026_v41 = vrot.slane %v1025_v30, 1  ;;  %v1038_v42 = vrot.slane %v1037_v31, 2  ;;  %v98_v43 = vpop.permute.xlu1 %97  ;;  %v1076_v57 = vsel %vm569_vm11, %v1020_v39, %v1013_v40 }
 0x307   : > { %v1058_v44 = vadd.f32 %v1057_v37, %v1056_v32  ;;  %v1049_v45 = vsel %vm1006_vm4, %v1004_v38, 0.0  ;;  %v95_v46 = vpop.permute.xlu0 %94  ;;  %vm126_vm5 = vcmp.eq.s32.totalorder %v98_v43, %v2138_v2  ;;  %v1046_v54 = vadd.f32 %v1045_v36, %v1044_v27 }
 0x308   : > { %v1027_v47 = vadd.f32 %v1026_v41, %v1025_v30  ;;  %v1039_v50 = vadd.f32 %v1038_v42, %v1037_v31  ;;  %v1050_v52 = vrot.slane %v1049_v45, 4  ;;  %vm125_vm6 = vcmp.eq.s32.totalorder %v95_v46, %v2138_v2 }
 0x309   : > { %v1059_v55 = vrot.slane %v1058_v44, 2  ;;  %v1639_v61 = vsel %vm125_vm6, 1.0, %v2072_v17  ;;  %v1640_v3 = vsel %vm126_vm5, 1.0, %v2072_v17  ;;  %v1034_v10 = vadd.f32 %v1033_v53, %v1032_v34 }
 0x30a   : > { %v1040_v58 = vrot.slane %v1039_v50, 1  ;;  %v1051_v60 = vadd.f32 %v1050_v52, %v1049_v45  ;;  %v104_v62 = vpop.permute.xlu1 %103  ;;  %v1077_v63 = vsel %vm571_vm12, %v1027_v47, %v1076_v57  ;;  %1799 = vmatprep.mubr.msk.f32.mxu0 %vm167_vm1, %v1639_v61  ;;  %v1047_v11 = vrot.slane %v1046_v54, 1 }
 0x30b   : > { %v1060_v1 = vadd.f32 %v1059_v55, %v1058_v44  ;;  %v101_v4 = vpop.permute.xlu0 %100  ;;  %vm128_vm7 = vcmp.eq.s32.totalorder %v104_v62, %v2138_v2  ;;  %1800 = vmatmul.mubr.msk.f32.gmra.mrb[8].mxu0 %vm167_vm1, %v1640_v3  ;;  %v1078_v19 = vsel %vm573_vm13, %v1034_v10, %v1077_v63 }
 0x30c   : > { %v1041_v48 = vadd.f32 %v1040_v58, %v1039_v50  ;;  %v1052_v7 = vrot.slane %v1051_v60, 2  ;;  %vm127_vm8 = vcmp.eq.s32.totalorder %v101_v4, %v2138_v2  ;;  %v1642_v16 = vsel %vm128_vm7, 1.0, %v2072_v17 }
 0x30d   : > { %v1641_v12 = vsel %vm127_vm8, 1.0, %v2072_v17  ;;  %v1061_v15 = vrot.slane %v1060_v1, 1  ;;  %v1048_v56 = vadd.f32 %v1047_v11, %v1046_v54 }
 0x30e   : > { %v1053_v13 = vadd.f32 %v1052_v7, %v1051_v60  ;;  %v110_v14 = vpop.permute.xlu1 %109  ;;  %1802 = vmatprep.mubr.msk.f32.mxu0 %vm167_vm1, %v1641_v12  ;;  %v1079_v51 = vsel %vm575_vm14, %v1041_v48, %v1078_v19 }
 0x30f   : > { %v107_v18 = vpop.permute.xlu0 %106  ;;  %vm130_vm9 = vcmp.eq.s32.totalorder %v110_v14, %v2138_v2  ;;  %1803 = vmatmul.mubr.msk.f32.gmra.mrb[10].mxu0 %vm167_vm1, %v1642_v16  ;;  %v1062_v21 = vadd.f32 %v1061_v15, %v1060_v1  ;;  %v1080_v23 = vsel %vm577_vm15, %v1048_v56, %v1079_v51 }
 0x310   : > { %v1054_v49 = vrot.slane %v1053_v13, 1  ;;  %vm129_vm4 = vcmp.eq.s32.totalorder %v107_v18, %v2138_v2  ;;  %v1644_v9 = vsel %vm130_vm9, 1.0, %v2072_v17 }
 0x311   : > { %v1643_v59 = vsel %vm129_vm4, 1.0, %v2072_v17 }
 0x312   : > { %v1055_v5 = vadd.f32 %v1054_v49, %v1053_v13  ;;  %v116_v20 = vpop.permute.xlu1 %115  ;;  %1805 = vmatprep.mubr.msk.f32.mxu0 %vm167_vm1, %v1643_v59 }
 0x313   : > { %v113_v22 = vpop.permute.xlu0 %112  ;;  %vm132_vm5 = vcmp.eq.s32.totalorder %v116_v20, %v2138_v2  ;;  %1806 = vmatmul.mubr.msk.f32.gmra.mrb[12].mxu0 %vm167_vm1, %v1644_v9 }
 0x314   : > { %vm131_vm6 = vcmp.eq.s32.totalorder %v113_v22, %v2138_v2  ;;  %v1081_v24 = vsel %vm579_vm2, %v1055_v5, %v1080_v23  ;;  %v1646_v27 = vsel %vm132_vm5, 1.0, %v2072_v17 }
 0x315   : > { %v1645_v25 = vsel %vm131_vm6, 1.0, %v2072_v17  ;;  %v1082_v26 = vsel %vm581_vm3, %v1062_v21, %v1081_v24 }
 0x316   : > { %1083 = vrot.lane.b32.xlu0 %v1082_v26, %s2077_s19  ;;  %1808 = vmatprep.mubr.msk.f32.mxu0 %vm167_vm1, %v1645_v25 }
 0x317   : > { %1809 = vmatmul.mubr.msk.f32.gmra.mrb[14].mxu0 %vm167_vm1, %v1646_v27  ;;  %vm1178_vm1 = vcmask (!%p1692_p5), 253952  }
 0x318   : > { %1861 = vmatprep.mubr.msk.f32.mxu0 %vm2074_vm10, %v2072_v17 }
 0x388   : > { %v1084_v28 = vpop.permute.xlu0 %1083 }
 0x389   : > { %1862 = vmatmul.mubr.msk.f32.vlgmr.msra.gmra.mrb[16].mxu0 %vm37_vm0, %v1084_v28 }
 0x3de   : > { %v1801_v29 = vpop.f32.mrb[8].mxu0 }
 0x3df   : > { %v424_v30 = vsel %vm37_vm0, %v1801_v29, 0.0  ;;  %v322_v31 = vpop.f32.mrb[9].mxu0 }
 0x3e0   : > { %v425_v32 = vrot.slane %v424_v30, 4  ;;  %v417_v34 = vsel %vm37_vm0, %v322_v31, 0.0 }
 0x3e1   : > { %v418_v36 = vrot.slane %v417_v34, 4 }
 0x3e2   : > { %v426_v37 = vadd.f32 %v425_v32, %v424_v30  ;;  %v1804_v38 = vpop.f32.mrb[10].mxu0 }
 0x3e3   : > { %v419_v39 = vadd.f32 %v418_v36, %v417_v34  ;;  %v438_v40 = vsel %vm37_vm0, %v1804_v38, 0.0  ;;  %v332_v41 = vpop.f32.mrb[11].mxu0 }
 0x3e4   : > { %v427_v42 = vrot.slane %v426_v37, 2  ;;  %v439_v43 = vrot.slane %v438_v40, 4  ;;  %v431_v44 = vsel %vm37_vm0, %v332_v41, 0.0 }
 0x3e5   : > { %v420_v45 = vrot.slane %v419_v39, 2  ;;  %v432_v46 = vrot.slane %v431_v44, 4 }
 0x3e6   : > { %v428_v47 = vadd.f32 %v427_v42, %v426_v37  ;;  %v440_v50 = vadd.f32 %v439_v43, %v438_v40  ;;  %v1807_v52 = vpop.f32.mrb[12].mxu0  ;;  %v655_v43 = vadd.f32 %v2302_v8, %v2353_v33 }
 0x3e7   : > { %v421_v53 = vadd.f32 %v420_v45, %v419_v39  ;;  %v433_v54 = vadd.f32 %v432_v46, %v431_v44  ;;  %v452_v55 = vsel %vm37_vm0, %v1807_v52, 0.0  ;;  %v342_v57 = vpop.f32.mrb[13].mxu0 }
 0x3e8   : > { %v429_v58 = vrot.slane %v428_v47, 1  ;;  %v441_v60 = vrot.slane %v440_v50, 2  ;;  %v453_v61 = vrot.slane %v452_v55, 4  ;;  %v445_v62 = vsel %vm37_vm0, %v342_v57, 0.0 }
 0x3e9   : > { %v422_v63 = vrot.slane %v421_v53, 1  ;;  %v434_v1 = vrot.slane %v433_v54, 2  ;;  %v446_v3 = vrot.slane %v445_v62, 4  ;;  %v1666_v44 = vmul.f32 -1.442695, %v655_v43 }
 0x3ea   : > { %v2407_v4 = vadd.f32 %v429_v58, %v428_v47  ;;  %v442_v48 = vadd.f32 %v441_v60, %v440_v50  ;;  %v454_v7 = vadd.f32 %v453_v61, %v452_v55  ;;  %v1810_v10 = vpop.f32.mrb[14].mxu0 }
 0x3eb   : > { %v2409_v11 = vadd.f32 %v422_v63, %v421_v53  ;;  %v435_v12 = vadd.f32 %v434_v1, %v433_v54  ;;  %v447_v13 = vadd.f32 %v446_v3, %v445_v62  ;;  %v466_v14 = vsel %vm37_vm0, %v1810_v10, 0.0  ;;  %v352_v15 = vpop.f32.mrb[15].mxu0 }
 0x3ec   : > { %v443_v16 = vrot.slane %v442_v48, 1  ;;  %v455_v18 = vrot.slane %v454_v7, 2  ;;  %v467_v19 = vrot.slane %v466_v14, 4  ;;  %v459_v49 = vsel %vm37_vm0, %v352_v15, 0.0 }
 0x3ed   : > { %v436_v51 = vrot.slane %v435_v12, 1  ;;  %v448_v56 = vrot.slane %v447_v13, 2  ;;  %v460_v59 = vrot.slane %v459_v49, 4 }
 0x3ee   : > { %v2413_v5 = vadd.f32 %v443_v16, %v442_v48  ;;  %v456_v20 = vadd.f32 %v455_v18, %v454_v7  ;;  %v468_v9 = vadd.f32 %v467_v19, %v466_v14 }
 0x3ef   : > { %v2415_v22 = vadd.f32 %v436_v51, %v435_v12  ;;  %v449_v21 = vadd.f32 %v448_v56, %v447_v13  ;;  %v461_v23 = vadd.f32 %v460_v59, %v459_v49 }
 0x3f0   : > { %v457_v24 = vrot.slane %v456_v20, 1  ;;  %v469_v25 = vrot.slane %v468_v9, 2 }
 0x3f1   : > { %v450_v26 = vrot.slane %v449_v21, 1  ;;  %v462_v27 = vrot.slane %v461_v23, 2 }
 0x3f2   : > { %v2417_v28 = vadd.f32 %v457_v24, %v456_v20  ;;  %v470_v29 = vadd.f32 %v469_v25, %v468_v9 }
 0x3f3   : > { %v2419_v30 = vadd.f32 %v450_v26, %v449_v21  ;;  %v463_v31 = vadd.f32 %v462_v27, %v461_v23 }
 0x3f4   : > { %v471_v32 = vrot.slane %v470_v29, 1 }
 0x3f5   : > { %v464_v34 = vrot.slane %v463_v31, 1 }
 0x3f6   : > { %v2421_v36 = vadd.f32 %v471_v32, %v470_v29 }
 0x3f7   : > { %v2423_v37 = vadd.f32 %v464_v34, %v463_v31 }
 0x45c   : > { %v1153_v38 = vpop.f32.mrb[16].mxu0 }
 0x45d   : > { %1158 = vrot.lane.b32.xlu1 %v1153_v38, %s2078_s20  ;;  %v1863_v39 = vpop.f32.mrb[17].mxu0 }
 0x4cf   : > { %v1159_v40 = vpop.permute.xlu1 %1158 }
 0x4d0   : > { %v1161_v41 = vadd.f32 %v1159_v40, %v2353_v33 }
 0x4d2   : > { %2017 = vtanh.f32 %v1161_v41 }
 0x4d3   : > { %2019 = vpow2.f32 %v1666_v44 }
 0x4dc   : > { %v2018_v42 = vpop.eup %2017 }
 0x4dd   : > { %1167 = vrot.lane.b32.xlu0 %v2018_v42, %s2078_s20  ;;  %v2020_v45 = vpop.eup %2019 }
 0x4de   : > { %v659_v46 = vadd.f32 1.0, %v2020_v45 }
 0x4e0   : > { %2021 = vrcp.f32 %v659_v46 }
 0x4ea   : > { %v2022_v47 = vpop.eup %2021 }
 0x4eb   : > { %v1163_v50 = vsub.f32 1.0, %v2022_v47 }
 0x4ed   : > { %v1165_v53 = vmul.f32 %v1163_v50, %v2281_v6 }
 0x54c   : > { %1176 = sbr.rel (%p1692_p5) target bundleno = 1365 (0x555), region = 44 }
 0x54f   : > { %v1168_v52 = vpop.permute.xlu0 %1167 }
 0x550   : > { %v1170_v54 = vmul.f32 %v2022_v47, %v1168_v52 }
 0x552   : > { %v2429_v55 = vadd.f32 %v1170_v54, %v1165_v53 }
 0x554   : > { %1179 = vst.msk [vmem:[%s1177_s21] sm:$0x1] %vm1178_vm1, %v2429_v55 }
 0x555 PF: > { %s1180_s22 = sadd.s32 1, %s2199_s26 }
 0x556   : > { %s1181_s23 = sld [smem:[#allocation4 + %s1180_s22]] }
 0x55c   : > { %p1693_p6 = scmp.lt.s32.totalorder %s1181_s23, 0 }
 0x55d   : > { %vm1187_vm7 = vcmask (!%p1693_p6), 254977   ;;  %s1186_s24 = scalar_lea.vmem (!%p1693_p6), [#allocation2], %s1181_s23 }
 0x55e   : > { %1185 = sbr.rel (%p1693_p6) target bundleno = 1381 (0x565), region = 48  ;;  %1188 = vst.msk [vmem:[%s1186_s24 - $0x1] sm:$0x2] (!%p1693_p6), %vm1187_vm7, %v2429_v55 }
 0x565 PF: > { %s1189_s25 = sadd.s32 2, %s2199_s26 }
 0x566   : > { %s1190_s27 = sld [smem:[#allocation4 + %s1189_s25]] }
 0x56c   : > { %p1694_p7 = scmp.lt.s32.totalorder %s1190_s27, 0 }
 0x56d   : > { %vm1196_vm8 = vcmask (!%p1694_p7), 256002   ;;  %s1195_s18 = scalar_lea.vmem (!%p1694_p7), [#allocation2], %s1190_s27 }
 0x56e   : > { %1194 = sbr.rel (%p1694_p7) target bundleno = 1397 (0x575), region = 52  ;;  %1197 = vst.msk [vmem:[%s1195_s18 - $0x2] sm:$0x4] (!%p1694_p7), %vm1196_vm8, %v2429_v55 }
 0x575 PF: > { %s1198_s29 = sadd.s32 3, %s2199_s26 }
 0x576   : > { %s1199_s30 = sld [smem:[#allocation4 + %s1198_s29]] }
 0x57c   : > { %p1695_p8 = scmp.lt.s32.totalorder %s1199_s30, 0 }
 0x57d   : > { %vm1205_vm9 = vcmask (!%p1695_p8), 257027   ;;  %s1204_s10 = scalar_lea.vmem (!%p1695_p8), [#allocation2], %s1199_s30 }
 0x57e   : > { %1203 = sbr.rel (%p1695_p8) target bundleno = 1413 (0x585), region = 56  ;;  %1206 = vst.msk [vmem:[%s1204_s10 - $0x3] sm:$0x8] (!%p1695_p8), %vm1205_vm9, %v2429_v55 }
 0x585 PF: > { %s1207_s11 = sadd.s32 4, %s2199_s26 }
 0x586   : > { %s1208_s12 = sld [smem:[#allocation4 + %s1207_s11]] }
 0x58c   : > { %p1696_p9 = scmp.lt.s32.totalorder %s1208_s12, 0 }
 0x58d   : > { %vm1214_vm4 = vcmask (!%p1696_p9), 258052   ;;  %s1213_s13 = scalar_lea.vmem (!%p1696_p9), [#allocation2], %s1208_s12 }
 0x58e   : > { %1212 = sbr.rel (%p1696_p9) target bundleno = 1429 (0x595), region = 60  ;;  %1215 = vst.msk [vmem:[%s1213_s13 - $0x4] sm:$0x10] (!%p1696_p9), %vm1214_vm4, %v2429_v55 }
 0x595 PF: > { %s1216_s14 = sadd.s32 5, %s2199_s26 }
 0x596   : > { %s1217_s15 = sld [smem:[#allocation4 + %s1216_s14]] }
 0x59c   : > { %p1697_p10 = scmp.lt.s32.totalorder %s1217_s15, 0 }
 0x59d   : > { %vm1223_vm5 = vcmask (!%p1697_p10), 259077   ;;  %s1222_s17 = scalar_lea.vmem (!%p1697_p10), [#allocation2], %s1217_s15 }
 0x59e   : > { %1221 = sbr.rel (%p1697_p10) target bundleno = 1445 (0x5a5), region = 64  ;;  %1224 = vst.msk [vmem:[%s1222_s17 - $0x5] sm:$0x20] (!%p1697_p10), %vm1223_vm5, %v2429_v55 }
 0x5a5 PF: > { %s1225_s16 = sadd.s32 6, %s2199_s26 }
 0x5a6   : > { %s1226_s20 = sld [smem:[#allocation4 + %s1225_s16]] }
 0x5ac   : > { %p1698_p11 = scmp.lt.s32.totalorder %s1226_s20, 0 }
 0x5ad   : > { %vm1232_vm6 = vcmask (!%p1698_p11), 260102   ;;  %s1231_s21 = scalar_lea.vmem (!%p1698_p11), [#allocation2], %s1226_s20 }
 0x5ae   : > { %1230 = sbr.rel (%p1698_p11) target bundleno = 1461 (0x5b5), region = 68  ;;  %1233 = vst.msk [vmem:[%s1231_s21 - $0x6] sm:$0x40] (!%p1698_p11), %vm1232_vm6, %v2429_v55 }
 0x5b5 PF: > { %s1234_s22 = sadd.s32 7, %s2199_s26 }
 0x5b6   : > { %s1235_s23 = sld [smem:[#allocation4 + %s1234_s22]] }
 0x5bc   : > { %p1699_p12 = scmp.lt.s32.totalorder %s1235_s23, 0 }
 0x5bd   : > { %vm1241_vm1 = vcmask (!%p1699_p12), 261127   ;;  %s1240_s24 = scalar_lea.vmem (!%p1699_p12), [#allocation2], %s1235_s23 }
 0x5be   : > { %1239 = sbr.rel (%p1699_p12) target bundleno = 1477 (0x5c5), region = 72  ;;  %1242 = vst.msk [vmem:[%s1240_s24 - $0x7] sm:$0x80] (!%p1699_p12), %vm1241_vm1, %v2429_v55 }
 0x5c5 PF: > { %1944 = vmatprep.subr.bf16.mxu0 %v2073_v35  ;;  %v1706_v6 = vld [vmem:[%s2562_s5 + $0x60] sm:$0xff]  ;;  %v1707_v8 = vld [vmem:[%s2562_s5 + $0x68] sm:$0xff]  ;;  %v1708_v57 = vld [vmem:[%s2562_s5 + $0x70] sm:$0xff]  ;;  %1883 = vmatprep.mubr.msk.f32.mxu0 %vm2074_vm10, %v2072_v17  ;;  %v1342_v58 = vsel %vm569_vm11, %v2407_v4, %v2409_v11  ;;  %s1592_s24 = scalar_lea.vmem [#allocation5], %s2199_s26  ;;  %s47_s0 = sadd.s32 1, %s2067_s0  }
 0x5c6   : > { %v1945_v60 = vpack.c.bf16 %v1707_v8, %v1706_v6  ;;  %v1709_v61 = vld [vmem:[%s2562_s5 + $0x78] sm:$0xff]  ;;  %v1343_v62 = vsel %vm571_vm12, %v2415_v22, %v1342_v58  ;;  %1938 = vmatprep.subr.bf16.mxu1 %v2073_v35  ;;  %1872 = vmatprep.mubr.msk.f32.mxu1 %vm2074_vm10, %v2072_v17  ;;  %v1700_v10 = vld [vmem:[%s2562_s5 + $0x80] sm:$0xff]  ;;  %v1701_v11 = vld [vmem:[%s2562_s5 + $0x88] sm:$0xff]  ;;  %p44_p13 = scmp.ge.s32.totalorder %s47_s0, 7  }
 0x5c7   : > { %v1344_v63 = vsel %vm573_vm13, %v2413_v5, %v1343_v62  ;;  %v1948_v1 = vpack.c.bf16 %v1709_v61, %v1708_v57  ;;  %v1702_v12 = vld [vmem:[%s2562_s5 + $0x90] sm:$0xff]  ;;  %v1939_v13 = vpack.c.bf16 %v1701_v11, %v1700_v10  ;;  %v1703_v14 = vld [vmem:[%s2562_s5 + $0x98] sm:$0xff]  ;;  %v1427_v16 = vld [vmem:[%s2564_s7] sm:$0xff] }
 0x5c8   : > { %1946 = vmatpush3.bf16.msra.mxu0 %v1945_v60  ;;  %v1345_v3 = vsel %vm575_vm14, %v2419_v30, %v1344_v63  ;;  %v1942_v15 = vpack.c.bf16 %v1703_v14, %v1702_v12  ;;  %v1428_v18 = vld [vmem:[%s2564_s7 + $0x8] sm:$0xff]  ;;  %v1711_v19 = vld [vmem:[%s2564_s7 + $0x20] sm:$0xff]  ;;  %v1430_v59 = vld [vmem:[%s2564_s7 + $0x18] sm:$0xff] }
 0x5c9   : > { %1947 = vmatprep.subr.bf16.mxu0 %v2073_v35  ;;  %v1346_v4 = vsel %vm577_vm15, %v2417_v28, %v1345_v3  ;;  %1940 = vmatpush3.bf16.msra.mxu1 %v1939_v13  ;;  %v1957_v49 = vpack.c.bf16 %v1428_v18, %v1427_v16  ;;  %v1712_v51 = vld [vmem:[%s2564_s7 + $0x28] sm:$0xff]  ;;  %v1713_v5 = vld [vmem:[%s2564_s7 + $0x30] sm:$0xff]  ;;  %v1714_v20 = vld [vmem:[%s2564_s7 + $0x38] sm:$0xff] }
 0x5ca   : > { %v1347_v48 = vsel %vm579_vm2, %v2423_v37, %v1346_v4  ;;  %1941 = vmatprep.subr.bf16.mxu1 %v2073_v35  ;;  %v1951_v56 = vpack.c.bf16 %v1712_v51, %v1711_v19  ;;  %v1954_v22 = vpack.c.bf16 %v1714_v20, %v1713_v5  ;;  %v1704_v24 = vld [vmem:[%s2563_s6] ss:$0 sm:$0xff] }
 0x5cb   : > { %v1348_v7 = vsel %vm581_vm3, %v2421_v36, %v1347_v48  ;;  %v1717_v37 = vld [vmem:[%s2565_s8] ss:$0 sm:$0xff] }
 0x5cc   : > { %1949 = vmatpush3.bf16.msra.mxu0 %v1948_v1 }
 0x5cd   : > { %1956 = vmatprep.subr.bf16.mxu0 %v2073_v35  ;;  %1943 = vmatpush3.bf16.msra.mxu1 %v1942_v15 }
 0x5ce   : > { %1950 = vmatprep.subr.bf16.mxu1 %v2073_v35 }
 0x5cf   : > { %1884 = vmatmul.mubr.msk.f32.vlgmr.msra.gmra.mrb[18].mxu0 %vm37_vm0, %v1348_v7 }
 0x5d0   : > { %1905 = vmatprep.mubr.msk.f32.mxu0 %vm2074_vm10, %v2072_v17  ;;  %1873 = vmatmul.mubr.msk.f32.vlgmr.msra.gmra.mrb[12].mxu1 %vm37_vm0, %v2429_v55 }
 0x5d1   : > { %1894 = vmatprep.mubr.msk.f32.mxu1 %vm2074_vm10, %v2072_v17  ;;  %v1429_v17 = vld [vmem:[%s2564_s7 + $0x10] sm:$0xff]  ;;  %1958 = vmatpush3.bf16.msra.mxu0 %v1957_v49 }
 0x5d2   : > { %v1960_v9 = vpack.c.bf16 %v1430_v59, %v1429_v17  ;;  %1952 = vmatpush3.bf16.msra.mxu1 %v1951_v56  ;;  %1959 = vmatprep.subr.bf16.mxu0 %v2073_v35 }
 0x5d3   : > { %1953 = vmatprep.subr.bf16.mxu1 %v2073_v35 }
 0x5d5   : > { %1961 = vmatpush3.bf16.msra.mxu0 %v1960_v9 }
 0x5d6   : > { %1955 = vmatpush3.bf16.msra.mxu1 %v1954_v22 }
 0x6a2   : > { %v1417_v21 = vpop.f32.mrb[18].mxu0 }
 0x6a3   : > { %1422 = vrot.lane.b32.xlu0 %v1417_v21, %s2077_s19  ;;  %v1885_v23 = vpop.f32.mrb[19].mxu0  ;;  %v1324_v25 = vpop.f32.mrb[12].mxu1 }
 0x6a4   : > { %v1325_v26 = vadd.f32 %v1704_v24, %v1324_v25  ;;  %v1874_v27 = vpop.f32.mrb[13].mxu1 }
 0x6a6   : > { %v1328_v28 = vmax.f32 %v1325_v26, 0.0 }
 0x6a8   : > { %1906 = vmatmul.mubr.msk.f32.vlgmr.msra.gmra.mrb[20].mxu0 %vm37_vm0, %v1328_v28 }
 0x715   : > { %v1423_v29 = vpop.permute.xlu0 %1422 }
 0x716   : > { %v1425_v35 = vadd.f32 %v1423_v29, %v2353_v33 }
 0x718   : > { %v1426_v30 = vmax.f32 %v1425_v35, 0.0 }
 0x71a   : > { %1437 = vrot.lane.b32.xlu0 %v1426_v30, %s2075_s28  ;;  %s2079_s28 = smov (%p44_p13), [#allocation5]  }
 0x71b   :  { %s1599_s25 = sshll.u32 (%p44_p13), %s2079_s28, 4  ;;  %s1600_s25 = int_to_ptr.vmem [resolvable:$true] %s1599_s25 }
 0x71c   :  { %s2035_s27 = scalar_lea.vmem (%p44_p13), %s1600_s25, 896  ;;  %p2040_p1 = scmp.lt.s32.totalorder (%p44_p13), %s1600_s25, %s1600_s25 }
 0x71d   :  { %p2036_p0 = scmp.ne.s32.totalorder (%p44_p13), %s1600_s25, %s2035_s27  ;;  %p2041_p2 = scmp.lt.s32.totalorder (%p44_p13), %s2035_s27, %s2035_s27 }
 0x71f   :  { %p2042_p3 = por (%p44_p13), %p2041_p2, %p2040_p1 }
 0x721   :  { %p2043_p4 = pnand (%p44_p13), %p2042_p3, %p2036_p0 }
 0x77b   : > { %v1580_v32 = vpop.f32.mrb[20].mxu0 }
 0x77c   : > { %v1907_v34 = vpop.f32.mrb[21].mxu0 }
 0x78c   : > { %v1438_v31 = vpop.permute.xlu0 %1437 }
 0x78d   : > { %1895 = vmatmul.mubr.msk.f32.vlgmr.msra.gmra.mrb[14].mxu1 %vm37_vm0, %v1438_v31 }
 0x85f   :  { %46 = sbr.rel (!%p44_p13) target bundleno = 18 (0x12), region = 107 }
 0x860   : > { %v1507_v36 = vpop.f32.mrb[14].mxu1 }
 0x861   : > { %v1581_v38 = vadd.f32 %v1580_v32, %v1507_v36  ;;  %v1896_v39 = vpop.f32.mrb[15].mxu1 }
 0x863   : > { %v1591_v40 = vadd.f32 %v1717_v37, %v1581_v38 }
 0x865   : > { %1593 = vst [vmem:[%s1592_s24] sm:$0xff] %v1591_v40 }
 0x866   :  { %2046 = shalt.err (!%p2043_p4)
}
 0x867   :  { %s2047_s26 = scalar_lea.hbm %s2566_s9, 896 }
 0x868   :  { %p2048_p5 = scmp.ne.s32.totalorder %s2566_s9, %s2047_s26  ;;  %p2051_p6 = scmp.lt.u32.totalorder %s2047_s26, %s2566_s9 }
 0x86a   :  { %p2053_p7 = pnand %p2051_p6, %p2048_p5 }
 0x86c   :  { %2056 = shalt.err (!%p2053_p7)
}
 0x86d   :  { %s2080_s1 = smov 128   ;;  %s2081_s2 = smov 8  }
 0x86e   :  { %1605 = dma.vmem_to_hbm [thread:$0]  %s1600_s25, 896, %s2566_s9, [#allocation6], %s2080_s1, %s2080_s1, %s2081_s2  }
 0x86f   :  { %2063 = dma.done.wait [#allocation6], 896  }
 0x870   :  { %2064 = vsyncadd [#allocation6], 4294966400 }
 0x871   :  { %1609 = vsyncpa [#allocation6], 1 }

</bundles_post_ra>
